<compile_context>
chip_gen: v6e
topology: v6e:2x2x1
jax: 0.10.0
libtpu: 0.0.40
codegen_flags: <defaults>
</compile_context>

<pallas_src>
import functools

import jax
import jax.numpy as jnp
from jax.experimental import pallas as pl
from jax.experimental.pallas import tpu as pltpu

EPS = 1e-06
SAFE_PROJ_THR = 1.0 - 0.001   # threshold used by HyperbolicOps.safe_proj


def _hyp_ffn_kernel(x_ref, w1_ref, b1_ref, w2_ref, b2_ref, o_ref, *, c, mm_dtype):
    sqrt_c = jnp.float32(c) ** 0.5

    def _atanh(z):
        # z in [0, 1 - EPS]; use EUP log instead of arctanh for Mosaic lowering.
        return 0.5 * jnp.log((1.0 + z) / (1.0 - z))

    def logmap0_factor(norm):
        z = jnp.minimum(sqrt_c * norm, 1.0 - EPS)
        return _atanh(z) / (sqrt_c * jnp.maximum(norm, EPS))

    def expmap0_factor(norm):
        return jnp.tanh(sqrt_c * norm) / (sqrt_c * jnp.maximum(norm, EPS))

    def row_norm(v):
        return jnp.sqrt(jnp.sum(v * v, axis=-1, keepdims=True))

    # Norm / transcendental math in f32; MXU operands in mm_dtype.
    x = x_ref[...].astype(jnp.float32)
    b1 = b1_ref[...]                       # f32 (prepared in wrapper)
    b2 = b2_ref[...]                       # f32

    # ---- layer1: logmap0(x) -> linear -> expmap0 -> safe_proj ----
    nx = row_norm(x)
    lhs1 = (logmap0_factor(nx) * x).astype(mm_dtype)
    h1 = jnp.dot(lhs1, w1_ref[...], preferred_element_type=jnp.float32) + b1

    n1 = row_norm(h1)
    g1 = expmap0_factor(n1)                      # expmap0 scale for h1
    ny1 = g1 * n1                                # ||expmap0(h1)||  (analytic)
    s1 = jnp.where(ny1 > SAFE_PROJ_THR,
                   SAFE_PROJ_THR / jnp.maximum(ny1, EPS), 1.0)   # safe_proj scale

    # ---- middle: logmap0 -> relu -> dropout -> expmap0 (fully fused) ----
    # TODO(synk): dropout is treated as eval-mode identity; training-mode
    # masking would use pltpu.prng_seed / pltpu.stateful_bernoulli.
    nm = ny1 * s1                                # norm after safe_proj (analytic)
    a = g1 * s1 * logmap0_factor(nm)             # per-row scale, a >= 0
    r = jnp.maximum(h1, 0.0)                     # relu(h1); relu(a*h1) = a*relu(h1)
    nr = row_norm(r)
    nt = a * nr                                  # ||relu(logmap0(safe_proj(...)))||
    g2 = expmap0_factor(nt)                      # expmap0 scale
    nu = g2 * nt                                 # ||expmap0(t)||  (analytic)

    # ---- layer2: logmap0 -> linear -> expmap0 -> safe_proj ----
    lhs2 = ((a * g2 * logmap0_factor(nu)) * r).astype(mm_dtype)
    h2 = jnp.dot(lhs2, w2_ref[...], preferred_element_type=jnp.float32) + b2

    n2 = row_norm(h2)
    g3 = expmap0_factor(n2)
    ny2 = g3 * n2
    s3 = jnp.where(ny2 > SAFE_PROJ_THR,
                   SAFE_PROJ_THR / jnp.maximum(ny2, EPS), 1.0)

    o_ref[...] = ((g3 * s3) * h2).astype(o_ref.dtype)


def hyperbolic_ffn(x, w1, b1, w2, b2, *, c: float = 0.05,
                   row_tile: int = 2048, vmem_limit_bytes=None):
    """HyperbolicFFN forward.

    x:  (..., input_dim) points in the Poincare ball.
    w1: (hidden_dim, input_dim), b1: (hidden_dim,)   [torch layout]
    w2: (output_dim, hidden_dim), b2: (output_dim,)
    """
    x = jnp.asarray(x)
    w1 = jnp.asarray(w1); b1 = jnp.asarray(b1)
    w2 = jnp.asarray(w2); b2 = jnp.asarray(b2)

    lead = x.shape[:-1]
    input_dim = x.shape[-1]
    hidden_dim = w1.shape[0]
    output_dim = w2.shape[0]

    x2d = x.reshape(-1, input_dim)
    rows = x2d.shape[0]

    # MXU operand dtype: bf16 matmuls only when inputs are already bf16.
    if (x.dtype == jnp.bfloat16 and w1.dtype == jnp.bfloat16
            and w2.dtype == jnp.bfloat16):
        mm_dtype = jnp.bfloat16
    else:
        mm_dtype = jnp.float32
    mm_itemsize = jnp.dtype(mm_dtype).itemsize
    io_itemsize = jnp.dtype(x.dtype).itemsize

    # Lane-align feature dims to 128 (zero padding is exact: padded columns
    # stay zero through both layers and never change row norms).
    pad128 = lambda n: -(-n // 128) * 128
    input_pad = pad128(input_dim)
    hidden_pad = pad128(hidden_dim)
    output_pad = pad128(output_dim)

    def pad2d(a, nr, nc):
        pr, pc = nr - a.shape[0], nc - a.shape[1]
        return jnp.pad(a, ((0, pr), (0, pc))) if (pr or pc) else a

    x2d_p = pad2d(x2d, rows, input_pad)
    w1_t = pad2d(w1.T.astype(mm_dtype), input_pad, hidden_pad)
    w2_t = pad2d(w2.T.astype(mm_dtype), hidden_pad, output_pad)
    b1_2d = pad2d(b1.reshape(1, hidden_dim).astype(jnp.float32), 1, hidden_pad)
    b2_2d = pad2d(b2.reshape(1, output_dim).astype(jnp.float32), 1, output_pad)

    # ---- generation-aware VMEM budgeting ----
    try:
        vmem_cap = int(pltpu.get_tpu_info().vmem_capacity_bytes)
    except Exception:
        vmem_cap = 64 << 20          # conservative fallback: v7x per-TC VMEM
    if vmem_limit_bytes is None:
        vmem_limit_bytes = min(int(vmem_cap * 0.85), 112 << 20)

    # Resident parameter bytes (worst case double-buffered, actual dtype).
    weight_bytes = 2 * ((input_pad * hidden_pad + hidden_pad * output_pad) * mm_itemsize
                        + (hidden_pad + output_pad) * 4)
    # Per-row bytes: double-buffered I/O in their dtype + live f32 temporaries
    # (x, h1, r, h2) + mm-dtype LHS copies.
    bytes_per_row = (2 * (input_pad + output_pad) * io_itemsize
                     + 4 * (input_pad + 2 * hidden_pad + output_pad)
                     + (input_pad + hidden_pad) * mm_itemsize)
    row_budget = max(1 << 20, int(vmem_cap * 0.6) - weight_bytes)
    # TODO(synk): if the weights alone exceed ~1/3 of per-TC VMEM (multi-thousand
    # hidden dims on v7x), switch to a K/N-tiled grid with a VMEM accumulator
    # instead of whole-resident weight blocks.

    # Sublane packing for the I/O dtype: 8 rows (f32), 16 (bf16), 32 (int8/fp8).
    sub = {4: 8, 2: 16, 1: 32}.get(io_itemsize, 8)
    row_tile_max = max(sub, (row_budget // max(bytes_per_row, 1)) // sub * sub)
    row_tile = int(min(row_tile, row_tile_max))
    rows_rounded = max(sub, -(-rows // sub) * sub)
    row_tile = min(row_tile, rows_rounded)
    # Give both v7x TensorCores work even when everything fits in one tile.
    if pl.cdiv(rows, row_tile) == 1 and rows > sub:
        half = -(-rows // 2)
        row_tile = max(sub, -(-half // sub) * sub)
    row_tile = max(sub, (row_tile // sub) * sub)

    grid = (pl.cdiv(rows, row_tile),)   # ragged last block handled by Pallas

    kernel = functools.partial(_hyp_ffn_kernel, c=c, mm_dtype=mm_dtype)

    cost = pl.CostEstimate(
        flops=2 * rows * (input_pad * hidden_pad + hidden_pad * output_pad),
        transcendentals=8 * rows,
        bytes_accessed=(rows * (input_pad + output_pad) * io_itemsize
                        + (input_pad * hidden_pad + hidden_pad * output_pad) * mm_itemsize
                        + (hidden_pad + output_pad) * 4),
    )

    def build(weight_pipeline_mode):
        def wspec(shape):
            if weight_pipeline_mode is None:
                return pl.BlockSpec(shape, lambda i: (0, 0))
            return pl.BlockSpec(shape, lambda i: (0, 0),
                                pipeline_mode=weight_pipeline_mode)

        return pl.pallas_call(
            kernel,
            out_shape=jax.ShapeDtypeStruct((rows, output_pad), x.dtype),
            grid_spec=pltpu.PrefetchScalarGridSpec(
                num_scalar_prefetch=0,
                grid=grid,
                in_specs=[
                    pl.BlockSpec((row_tile, input_pad), lambda i: (i, 0)),
                    wspec((input_pad, hidden_pad)),
                    wspec((1, hidden_pad)),
                    wspec((hidden_pad, output_pad)),
                    wspec((1, output_pad)),
                ],
                out_specs=pl.BlockSpec((row_tile, output_pad), lambda i: (i, 0)),
            ),
            compiler_params=pltpu.CompilerParams(
                dimension_semantics=("parallel",),
                vmem_limit_bytes=int(vmem_limit_bytes)),
            cost_estimate=cost,
        )

    args = (x2d_p, w1_t, b1_2d, w2_t, b2_2d)
    try:
        # Constant-index weight/bias blocks: single-buffered to halve residency.
        out = build(pl.Buffered(1))(*args)
    except Exception:
        # Fallback if single-buffering is unsupported by this JAX version.
        out = build(None)(*args)

    out = out[:, :output_dim]
    return out.reshape(lead + (output_dim,))


# ---------------- pure-JAX reference (mirrors the PyTorch module) ----------------

def _logmap0(x, c):
    sqrt_c = jnp.sqrt(jnp.float32(c))
    n = jnp.linalg.norm(x, axis=-1, keepdims=True)
    f = jnp.arctanh(jnp.minimum(sqrt_c * n, 1.0 - EPS)) / (sqrt_c * jnp.maximum(n, EPS))
    return f * x


def _expmap0(v, c):
    sqrt_c = jnp.sqrt(jnp.float32(c))
    n = jnp.linalg.norm(v, axis=-1, keepdims=True)
    f = jnp.tanh(sqrt_c * n) / (sqrt_c * jnp.maximum(n, EPS))
    return f * v


def _safe_proj(x):
    n = jnp.linalg.norm(x, axis=-1, keepdims=True)
    return jnp.where(n > SAFE_PROJ_THR, SAFE_PROJ_THR * x / jnp.maximum(n, EPS), x)


def _hyp_linear_ref(x, w, b, c):
    y = _logmap0(x, c) @ w.T + b
    return _safe_proj(_expmap0(y, c))


def _hyperbolic_ffn_ref(x, w1, b1, w2, b2, c):
    h = _hyp_linear_ref(x, w1, b1, c)
    t = jax.nn.relu(_logmap0(h, c))
    # dropout: eval-mode identity
    return _hyp_linear_ref(_expmap0(t, c), w2, b2, c)


if __name__ == "__main__":
    key = jax.random.PRNGKey(0)
    k_x, k_w1, k_b1, k_w2, k_b2 = jax.random.split(key, 5)

    B, S = 2, 8
    input_dim, hidden_dim, output_dim = 32, 64, 32
    c = 0.05

    # Module expects Poincare-ball inputs: map random tangent vectors into the ball.
    x_tan = jax.random.normal(k_x, (B, S, input_dim), dtype=jnp.float32)
    x = _expmap0(x_tan, c)

    # Torch-layout parameters: weight (out, in), bias (out,)
    w1 = jax.random.normal(k_w1, (hidden_dim, input_dim), jnp.float32) \
        * (2.0 / (input_dim + hidden_dim)) ** 0.5
    b1 = jax.random.uniform(k_b1, (hidden_dim,), jnp.float32, -0.05, 0.05)
    w2 = jax.random.normal(k_w2, (output_dim, hidden_dim), jnp.float32) \
        * (2.0 / (hidden_dim + output_dim)) ** 0.5
    b2 = jax.random.uniform(k_b2, (output_dim,), jnp.float32, -0.05, 0.05)

    out = hyperbolic_ffn(x, w1, b1, w2, b2, c=c)
    out = jax.block_until_ready(out)

    ref = _hyperbolic_ffn_ref(x, w1, b1, w2, b2, c)
    assert out.shape == (B, S, output_dim) and out.dtype == x.dtype
    err = float(jnp.max(jnp.abs(out - ref)))
    assert err < 1e-4, f"mismatch vs reference: {err}"

    print("KERNEL_OK")
</pallas_src>

<mosaic_0001>
module attributes {stable_mosaic.version = 11 : i64} {
  func.func @_hyp_ffn_kernel(%arg0: i32, %arg1: memref<8x128xf32, #tpu.memory_space<vmem>>, %arg2: memref<128x128xf32, #tpu.memory_space<vmem>>, %arg3: memref<1x128xf32, #tpu.memory_space<vmem>>, %arg4: memref<128x128xf32, #tpu.memory_space<vmem>>, %arg5: memref<1x128xf32, #tpu.memory_space<vmem>>, %arg6: memref<8x128xf32, #tpu.memory_space<vmem>>) attributes {dimension_semantics = [#tpu.dimension_semantics<parallel>], iteration_bounds = array<i64: 2>, scalar_prefetch = 0 : i64, scratch_operands = 0 : i64, tpu.core_type = #tpu.core_type<tc>, window_params = [{transform_indices = @transform_0, window_bounds = array<i64: 8, 128>}, {pipeline_mode = #tpu.pipeline_mode<synchronous>, transform_indices = @transform_1, window_bounds = array<i64: 128, 128>}, {pipeline_mode = #tpu.pipeline_mode<synchronous>, transform_indices = @transform_2, window_bounds = array<i64: 1, 128>}, {pipeline_mode = #tpu.pipeline_mode<synchronous>, transform_indices = @transform_3, window_bounds = array<i64: 128, 128>}, {pipeline_mode = #tpu.pipeline_mode<synchronous>, transform_indices = @transform_4, window_bounds = array<i64: 1, 128>}, {transform_indices = @transform_5, window_bounds = array<i64: 8, 128>}]} {
    %cst = arith.constant 5.000000e-02 : f32
    %cst_0 = arith.constant 5.000000e-01 : f32
    %0 = math.powf %cst, %cst_0 : f32
    %c0 = arith.constant 0 : index
    %c0_1 = arith.constant 0 : index
    %1 = vector.load %arg1[%c0, %c0_1] : memref<8x128xf32, #tpu.memory_space<vmem>>, vector<8x128xf32>
    %c0_2 = arith.constant 0 : index
    %c0_3 = arith.constant 0 : index
    %2 = vector.load %arg3[%c0_2, %c0_3] : memref<1x128xf32, #tpu.memory_space<vmem>>, vector<1x128xf32>
    %c0_4 = arith.constant 0 : index
    %c0_5 = arith.constant 0 : index
    %3 = vector.load %arg5[%c0_4, %c0_5] : memref<1x128xf32, #tpu.memory_space<vmem>>, vector<1x128xf32>
    %4 = arith.mulf %1, %1 : vector<8x128xf32>
    %cst_6 = arith.constant dense<0.000000e+00> : vector<8xf32>
    %5 = vector.multi_reduction <add>, %4, %cst_6 [1] : vector<8x128xf32> to vector<8xf32>
    %6 = vector.shape_cast %5 : vector<8xf32> to vector<8x1xf32>
    %7 = math.sqrt %6 : vector<8x1xf32>
    %8 = vector.broadcast %0 : f32 to vector<8x1xf32>
    %9 = arith.mulf %8, %7 : vector<8x1xf32>
    %cst_7 = arith.constant 0.999998986 : f32
    %10 = vector.broadcast %cst_7 : f32 to vector<8x1xf32>
    %11 = arith.minimumf %9, %10 : vector<8x1xf32>
    %cst_8 = arith.constant 1.000000e+00 : f32
    %12 = vector.broadcast %cst_8 : f32 to vector<8x1xf32>
    %13 = arith.addf %12, %11 : vector<8x1xf32>
    %cst_9 = arith.constant 1.000000e+00 : f32
    %14 = vector.broadcast %cst_9 : f32 to vector<8x1xf32>
    %15 = arith.subf %14, %11 : vector<8x1xf32>
    %16 = arith.divf %13, %15 : vector<8x1xf32>
    %17 = math.log %16 : vector<8x1xf32>
    %cst_10 = arith.constant 5.000000e-01 : f32
    %18 = vector.broadcast %cst_10 : f32 to vector<8x1xf32>
    %19 = arith.mulf %18, %17 : vector<8x1xf32>
    %cst_11 = arith.constant 9.99999997E-7 : f32
    %20 = vector.broadcast %cst_11 : f32 to vector<8x1xf32>
    %21 = arith.maximumf %7, %20 : vector<8x1xf32>
    %22 = vector.broadcast %0 : f32 to vector<8x1xf32>
    %23 = arith.mulf %22, %21 : vector<8x1xf32>
    %24 = arith.divf %19, %23 : vector<8x1xf32>
    %25 = vector.broadcast %24 : vector<8x1xf32> to vector<8x128xf32>
    %26 = arith.mulf %25, %1 : vector<8x128xf32>
    %c0_12 = arith.constant 0 : index
    %c0_13 = arith.constant 0 : index
    %27 = vector.load %arg2[%c0_12, %c0_13] : memref<128x128xf32, #tpu.memory_space<vmem>>, vector<128x128xf32>
    %cst_14 = arith.constant dense<0.000000e+00> : vector<8x128xf32>
    %28 = tpu.matmul %26, %27, %cst_14 {dimension_numbers = #tpu.dot_dimension_numbers<[1], [0], [0], [1], [0, 0, 1, 1], [], []>} : vector<8x128xf32>, vector<128x128xf32>, vector<8x128xf32> -> vector<8x128xf32>
    %29 = vector.broadcast %2 : vector<1x128xf32> to vector<8x128xf32>
    %30 = arith.addf %28, %29 : vector<8x128xf32>
    %31 = arith.mulf %30, %30 : vector<8x128xf32>
    %cst_15 = arith.constant dense<0.000000e+00> : vector<8xf32>
    %32 = vector.multi_reduction <add>, %31, %cst_15 [1] : vector<8x128xf32> to vector<8xf32>
    %33 = vector.shape_cast %32 : vector<8xf32> to vector<8x1xf32>
    %34 = math.sqrt %33 : vector<8x1xf32>
    %35 = vector.broadcast %0 : f32 to vector<8x1xf32>
    %36 = arith.mulf %35, %34 : vector<8x1xf32>
    %37 = math.tanh %36 : vector<8x1xf32>
    %cst_16 = arith.constant 9.99999997E-7 : f32
    %38 = vector.broadcast %cst_16 : f32 to vector<8x1xf32>
    %39 = arith.maximumf %34, %38 : vector<8x1xf32>
    %40 = vector.broadcast %0 : f32 to vector<8x1xf32>
    %41 = arith.mulf %40, %39 : vector<8x1xf32>
    %42 = arith.divf %37, %41 : vector<8x1xf32>
    %43 = arith.mulf %42, %34 : vector<8x1xf32>
    %cst_17 = arith.constant 9.990000e-01 : f32
    %44 = vector.broadcast %cst_17 : f32 to vector<8x1xf32>
    %45 = arith.cmpf ogt, %43, %44 : vector<8x1xf32>
    %cst_18 = arith.constant 9.99999997E-7 : f32
    %46 = vector.broadcast %cst_18 : f32 to vector<8x1xf32>
    %47 = arith.maximumf %43, %46 : vector<8x1xf32>
    %cst_19 = arith.constant 9.990000e-01 : f32
    %48 = vector.broadcast %cst_19 : f32 to vector<8x1xf32>
    %49 = arith.divf %48, %47 : vector<8x1xf32>
    %cst_20 = arith.constant 1.000000e+00 : f32
    %50 = vector.broadcast %cst_20 : f32 to vector<8x1xf32>
    %51 = arith.select %45, %49, %50 : vector<8x1xi1>, vector<8x1xf32>
    %52 = arith.mulf %43, %51 : vector<8x1xf32>
    %53 = arith.mulf %42, %51 : vector<8x1xf32>
    %54 = vector.broadcast %0 : f32 to vector<8x1xf32>
    %55 = arith.mulf %54, %52 : vector<8x1xf32>
    %cst_21 = arith.constant 0.999998986 : f32
    %56 = vector.broadcast %cst_21 : f32 to vector<8x1xf32>
    %57 = arith.minimumf %55, %56 : vector<8x1xf32>
    %cst_22 = arith.constant 1.000000e+00 : f32
    %58 = vector.broadcast %cst_22 : f32 to vector<8x1xf32>
    %59 = arith.addf %58, %57 : vector<8x1xf32>
    %cst_23 = arith.constant 1.000000e+00 : f32
    %60 = vector.broadcast %cst_23 : f32 to vector<8x1xf32>
    %61 = arith.subf %60, %57 : vector<8x1xf32>
    %62 = arith.divf %59, %61 : vector<8x1xf32>
    %63 = math.log %62 : vector<8x1xf32>
    %cst_24 = arith.constant 5.000000e-01 : f32
    %64 = vector.broadcast %cst_24 : f32 to vector<8x1xf32>
    %65 = arith.mulf %64, %63 : vector<8x1xf32>
    %cst_25 = arith.constant 9.99999997E-7 : f32
    %66 = vector.broadcast %cst_25 : f32 to vector<8x1xf32>
    %67 = arith.maximumf %52, %66 : vector<8x1xf32>
    %68 = vector.broadcast %0 : f32 to vector<8x1xf32>
    %69 = arith.mulf %68, %67 : vector<8x1xf32>
    %70 = arith.divf %65, %69 : vector<8x1xf32>
    %71 = arith.mulf %53, %70 : vector<8x1xf32>
    %cst_26 = arith.constant 0.000000e+00 : f32
    %72 = vector.broadcast %cst_26 : f32 to vector<8x128xf32>
    %73 = arith.maximumf %30, %72 : vector<8x128xf32>
    %74 = arith.mulf %73, %73 : vector<8x128xf32>
    %cst_27 = arith.constant dense<0.000000e+00> : vector<8xf32>
    %75 = vector.multi_reduction <add>, %74, %cst_27 [1] : vector<8x128xf32> to vector<8xf32>
    %76 = vector.shape_cast %75 : vector<8xf32> to vector<8x1xf32>
    %77 = math.sqrt %76 : vector<8x1xf32>
    %78 = arith.mulf %71, %77 : vector<8x1xf32>
    %79 = vector.broadcast %0 : f32 to vector<8x1xf32>
    %80 = arith.mulf %79, %78 : vector<8x1xf32>
    %81 = math.tanh %80 : vector<8x1xf32>
    %cst_28 = arith.constant 9.99999997E-7 : f32
    %82 = vector.broadcast %cst_28 : f32 to vector<8x1xf32>
    %83 = arith.maximumf %78, %82 : vector<8x1xf32>
    %84 = vector.broadcast %0 : f32 to vector<8x1xf32>
    %85 = arith.mulf %84, %83 : vector<8x1xf32>
    %86 = arith.divf %81, %85 : vector<8x1xf32>
    %87 = arith.mulf %86, %78 : vector<8x1xf32>
    %88 = arith.mulf %71, %86 : vector<8x1xf32>
    %89 = vector.broadcast %0 : f32 to vector<8x1xf32>
    %90 = arith.mulf %89, %87 : vector<8x1xf32>
    %cst_29 = arith.constant 0.999998986 : f32
    %91 = vector.broadcast %cst_29 : f32 to vector<8x1xf32>
    %92 = arith.minimumf %90, %91 : vector<8x1xf32>
    %cst_30 = arith.constant 1.000000e+00 : f32
    %93 = vector.broadcast %cst_30 : f32 to vector<8x1xf32>
    %94 = arith.addf %93, %92 : vector<8x1xf32>
    %cst_31 = arith.constant 1.000000e+00 : f32
    %95 = vector.broadcast %cst_31 : f32 to vector<8x1xf32>
    %96 = arith.subf %95, %92 : vector<8x1xf32>
    %97 = arith.divf %94, %96 : vector<8x1xf32>
    %98 = math.log %97 : vector<8x1xf32>
    %cst_32 = arith.constant 5.000000e-01 : f32
    %99 = vector.broadcast %cst_32 : f32 to vector<8x1xf32>
    %100 = arith.mulf %99, %98 : vector<8x1xf32>
    %cst_33 = arith.constant 9.99999997E-7 : f32
    %101 = vector.broadcast %cst_33 : f32 to vector<8x1xf32>
    %102 = arith.maximumf %87, %101 : vector<8x1xf32>
    %103 = vector.broadcast %0 : f32 to vector<8x1xf32>
    %104 = arith.mulf %103, %102 : vector<8x1xf32>
    %105 = arith.divf %100, %104 : vector<8x1xf32>
    %106 = arith.mulf %88, %105 : vector<8x1xf32>
    %107 = vector.broadcast %106 : vector<8x1xf32> to vector<8x128xf32>
    %108 = arith.mulf %107, %73 : vector<8x128xf32>
    %c0_34 = arith.constant 0 : index
    %c0_35 = arith.constant 0 : index
    %109 = vector.load %arg4[%c0_34, %c0_35] : memref<128x128xf32, #tpu.memory_space<vmem>>, vector<128x128xf32>
    %cst_36 = arith.constant dense<0.000000e+00> : vector<8x128xf32>
    %110 = tpu.matmul %108, %109, %cst_36 {dimension_numbers = #tpu.dot_dimension_numbers<[1], [0], [0], [1], [0, 0, 1, 1], [], []>} : vector<8x128xf32>, vector<128x128xf32>, vector<8x128xf32> -> vector<8x128xf32>
    %111 = vector.broadcast %3 : vector<1x128xf32> to vector<8x128xf32>
    %112 = arith.addf %110, %111 : vector<8x128xf32>
    %113 = arith.mulf %112, %112 : vector<8x128xf32>
    %cst_37 = arith.constant dense<0.000000e+00> : vector<8xf32>
    %114 = vector.multi_reduction <add>, %113, %cst_37 [1] : vector<8x128xf32> to vector<8xf32>
    %115 = vector.shape_cast %114 : vector<8xf32> to vector<8x1xf32>
    %116 = math.sqrt %115 : vector<8x1xf32>
    %117 = vector.broadcast %0 : f32 to vector<8x1xf32>
    %118 = arith.mulf %117, %116 : vector<8x1xf32>
    %119 = math.tanh %118 : vector<8x1xf32>
    %cst_38 = arith.constant 9.99999997E-7 : f32
    %120 = vector.broadcast %cst_38 : f32 to vector<8x1xf32>
    %121 = arith.maximumf %116, %120 : vector<8x1xf32>
    %122 = vector.broadcast %0 : f32 to vector<8x1xf32>
    %123 = arith.mulf %122, %121 : vector<8x1xf32>
    %124 = arith.divf %119, %123 : vector<8x1xf32>
    %125 = arith.mulf %124, %116 : vector<8x1xf32>
    %cst_39 = arith.constant 9.990000e-01 : f32
    %126 = vector.broadcast %cst_39 : f32 to vector<8x1xf32>
    %127 = arith.cmpf ogt, %125, %126 : vector<8x1xf32>
    %cst_40 = arith.constant 9.99999997E-7 : f32
    %128 = vector.broadcast %cst_40 : f32 to vector<8x1xf32>
    %129 = arith.maximumf %125, %128 : vector<8x1xf32>
    %cst_41 = arith.constant 9.990000e-01 : f32
    %130 = vector.broadcast %cst_41 : f32 to vector<8x1xf32>
    %131 = arith.divf %130, %129 : vector<8x1xf32>
    %cst_42 = arith.constant 1.000000e+00 : f32
    %132 = vector.broadcast %cst_42 : f32 to vector<8x1xf32>
    %133 = arith.select %127, %131, %132 : vector<8x1xi1>, vector<8x1xf32>
    %134 = arith.mulf %124, %133 : vector<8x1xf32>
    %135 = vector.broadcast %134 : vector<8x1xf32> to vector<8x128xf32>
    %136 = arith.mulf %135, %112 : vector<8x128xf32>
    %c0_43 = arith.constant 0 : index
    %c0_44 = arith.constant 0 : index
    %137 = vector.load %arg6[%c0_43, %c0_44] : memref<8x128xf32, #tpu.memory_space<vmem>>, vector<8x128xf32>
    tpu.vector_store %arg6[%c0_43, %c0_44], %136 {strides = array<i32>} : memref<8x128xf32, #tpu.memory_space<vmem>>, vector<8x128xf32>,
    return
  }
  func.func @transform_0(%arg0: i32) -> (i32, i32) {
    %c0_i32 = arith.constant 0 : i32
    %c0_i32_0 = arith.constant 0 : i32
    return %arg0, %c0_i32 : i32, i32
  }
  func.func @transform_1(%arg0: i32) -> (i32, i32) {
    %c0_i32 = arith.constant 0 : i32
    %c0_i32_0 = arith.constant 0 : i32
    %c0_i32_1 = arith.constant 0 : i32
    return %c0_i32, %c0_i32_0 : i32, i32
  }
  func.func @transform_2(%arg0: i32) -> (i32, i32) {
    %c0_i32 = arith.constant 0 : i32
    %c0_i32_0 = arith.constant 0 : i32
    %c0_i32_1 = arith.constant 0 : i32
    return %c0_i32, %c0_i32_0 : i32, i32
  }
  func.func @transform_3(%arg0: i32) -> (i32, i32) {
    %c0_i32 = arith.constant 0 : i32
    %c0_i32_0 = arith.constant 0 : i32
    %c0_i32_1 = arith.constant 0 : i32
    return %c0_i32, %c0_i32_0 : i32, i32
  }
  func.func @transform_4(%arg0: i32) -> (i32, i32) {
    %c0_i32 = arith.constant 0 : i32
    %c0_i32_0 = arith.constant 0 : i32
    %c0_i32_1 = arith.constant 0 : i32
    return %c0_i32, %c0_i32_0 : i32, i32
  }
  func.func @transform_5(%arg0: i32) -> (i32, i32) {
    %c0_i32 = arith.constant 0 : i32
    %c0_i32_0 = arith.constant 0 : i32
    return %arg0, %c0_i32 : i32, i32
  }
}

module attributes {stable_mosaic.version = 11 : i64} {
  func.func @_hyp_ffn_kernel(%arg0: i32, %arg1: memref<8x128xf32, #tpu.memory_space<vmem>>, %arg2: memref<128x128xf32, #tpu.memory_space<vmem>>, %arg3: memref<1x128xf32, #tpu.memory_space<vmem>>, %arg4: memref<128x128xf32, #tpu.memory_space<vmem>>, %arg5: memref<1x128xf32, #tpu.memory_space<vmem>>, %arg6: memref<8x128xf32, #tpu.memory_space<vmem>>) attributes {dimension_semantics = [#tpu.dimension_semantics<parallel>], iteration_bounds = array<i64: 2>, scalar_prefetch = 0 : i64, scratch_operands = 0 : i64, tpu.core_type = #tpu.core_type<tc>, window_params = [{transform_indices = @transform_0, window_bounds = array<i64: 8, 128>}, {pipeline_mode = #tpu.pipeline_mode<synchronous>, transform_indices = @transform_1, window_bounds = array<i64: 128, 128>}, {pipeline_mode = #tpu.pipeline_mode<synchronous>, transform_indices = @transform_2, window_bounds = array<i64: 1, 128>}, {pipeline_mode = #tpu.pipeline_mode<synchronous>, transform_indices = @transform_3, window_bounds = array<i64: 128, 128>}, {pipeline_mode = #tpu.pipeline_mode<synchronous>, transform_indices = @transform_4, window_bounds = array<i64: 1, 128>}, {transform_indices = @transform_5, window_bounds = array<i64: 8, 128>}]} {
    %cst = arith.constant 5.000000e-02 : f32
    %cst_0 = arith.constant 5.000000e-01 : f32
    %0 = math.powf %cst, %cst_0 : f32
    %c0 = arith.constant 0 : index
    %c0_1 = arith.constant 0 : index
    %1 = vector.load %arg1[%c0, %c0_1] : memref<8x128xf32, #tpu.memory_space<vmem>>, vector<8x128xf32>
    %c0_2 = arith.constant 0 : index
    %c0_3 = arith.constant 0 : index
    %2 = vector.load %arg3[%c0_2, %c0_3] : memref<1x128xf32, #tpu.memory_space<vmem>>, vector<1x128xf32>
    %c0_4 = arith.constant 0 : index
    %c0_5 = arith.constant 0 : index
    %3 = vector.load %arg5[%c0_4, %c0_5] : memref<1x128xf32, #tpu.memory_space<vmem>>, vector<1x128xf32>
    %4 = arith.mulf %1, %1 : vector<8x128xf32>
    %cst_6 = arith.constant dense<0.000000e+00> : vector<8xf32>
    %5 = vector.multi_reduction <add>, %4, %cst_6 [1] : vector<8x128xf32> to vector<8xf32>
    %6 = vector.shape_cast %5 : vector<8xf32> to vector<8x1xf32>
    %7 = math.sqrt %6 : vector<8x1xf32>
    %8 = vector.broadcast %0 : f32 to vector<8x1xf32>
    %9 = arith.mulf %8, %7 : vector<8x1xf32>
    %cst_7 = arith.constant 0.999998986 : f32
    %10 = vector.broadcast %cst_7 : f32 to vector<8x1xf32>
    %11 = arith.minimumf %9, %10 : vector<8x1xf32>
    %cst_8 = arith.constant 1.000000e+00 : f32
    %12 = vector.broadcast %cst_8 : f32 to vector<8x1xf32>
    %13 = arith.addf %12, %11 : vector<8x1xf32>
    %cst_9 = arith.constant 1.000000e+00 : f32
    %14 = vector.broadcast %cst_9 : f32 to vector<8x1xf32>
    %15 = arith.subf %14, %11 : vector<8x1xf32>
    %16 = arith.divf %13, %15 : vector<8x1xf32>
    %17 = math.log %16 : vector<8x1xf32>
    %cst_10 = arith.constant 5.000000e-01 : f32
    %18 = vector.broadcast %cst_10 : f32 to vector<8x1xf32>
    %19 = arith.mulf %18, %17 : vector<8x1xf32>
    %cst_11 = arith.constant 9.99999997E-7 : f32
    %20 = vector.broadcast %cst_11 : f32 to vector<8x1xf32>
    %21 = arith.maximumf %7, %20 : vector<8x1xf32>
    %22 = vector.broadcast %0 : f32 to vector<8x1xf32>
    %23 = arith.mulf %22, %21 : vector<8x1xf32>
    %24 = arith.divf %19, %23 : vector<8x1xf32>
    %25 = vector.broadcast %24 : vector<8x1xf32> to vector<8x128xf32>
    %26 = arith.mulf %25, %1 : vector<8x128xf32>
    %c0_12 = arith.constant 0 : index
    %c0_13 = arith.constant 0 : index
    %27 = vector.load %arg2[%c0_12, %c0_13] : memref<128x128xf32, #tpu.memory_space<vmem>>, vector<128x128xf32>
    %cst_14 = arith.constant dense<0.000000e+00> : vector<8x128xf32>
    %28 = tpu.matmul %26, %27, %cst_14 {dimension_numbers = #tpu.dot_dimension_numbers<[1], [0], [0], [1], [0, 0, 1, 1], [], []>} : vector<8x128xf32>, vector<128x128xf32>, vector<8x128xf32> -> vector<8x128xf32>
    %29 = vector.broadcast %2 : vector<1x128xf32> to vector<8x128xf32>
    %30 = arith.addf %28, %29 : vector<8x128xf32>
    %31 = arith.mulf %30, %30 : vector<8x128xf32>
    %cst_15 = arith.constant dense<0.000000e+00> : vector<8xf32>
    %32 = vector.multi_reduction <add>, %31, %cst_15 [1] : vector<8x128xf32> to vector<8xf32>
    %33 = vector.shape_cast %32 : vector<8xf32> to vector<8x1xf32>
    %34 = math.sqrt %33 : vector<8x1xf32>
    %35 = vector.broadcast %0 : f32 to vector<8x1xf32>
    %36 = arith.mulf %35, %34 : vector<8x1xf32>
    %37 = math.tanh %36 : vector<8x1xf32>
    %cst_16 = arith.constant 9.99999997E-7 : f32
    %38 = vector.broadcast %cst_16 : f32 to vector<8x1xf32>
    %39 = arith.maximumf %34, %38 : vector<8x1xf32>
    %40 = vector.broadcast %0 : f32 to vector<8x1xf32>
    %41 = arith.mulf %40, %39 : vector<8x1xf32>
    %42 = arith.divf %37, %41 : vector<8x1xf32>
    %43 = arith.mulf %42, %34 : vector<8x1xf32>
    %cst_17 = arith.constant 9.990000e-01 : f32
    %44 = vector.broadcast %cst_17 : f32 to vector<8x1xf32>
    %45 = arith.cmpf ogt, %43, %44 : vector<8x1xf32>
    %cst_18 = arith.constant 9.99999997E-7 : f32
    %46 = vector.broadcast %cst_18 : f32 to vector<8x1xf32>
    %47 = arith.maximumf %43, %46 : vector<8x1xf32>
    %cst_19 = arith.constant 9.990000e-01 : f32
    %48 = vector.broadcast %cst_19 : f32 to vector<8x1xf32>
    %49 = arith.divf %48, %47 : vector<8x1xf32>
    %cst_20 = arith.constant 1.000000e+00 : f32
    %50 = vector.broadcast %cst_20 : f32 to vector<8x1xf32>
    %51 = arith.select %45, %49, %50 : vector<8x1xi1>, vector<8x1xf32>
    %52 = arith.mulf %43, %51 : vector<8x1xf32>
    %53 = arith.mulf %42, %51 : vector<8x1xf32>
    %54 = vector.broadcast %0 : f32 to vector<8x1xf32>
    %55 = arith.mulf %54, %52 : vector<8x1xf32>
    %cst_21 = arith.constant 0.999998986 : f32
    %56 = vector.broadcast %cst_21 : f32 to vector<8x1xf32>
    %57 = arith.minimumf %55, %56 : vector<8x1xf32>
    %cst_22 = arith.constant 1.000000e+00 : f32
    %58 = vector.broadcast %cst_22 : f32 to vector<8x1xf32>
    %59 = arith.addf %58, %57 : vector<8x1xf32>
    %cst_23 = arith.constant 1.000000e+00 : f32
    %60 = vector.broadcast %cst_23 : f32 to vector<8x1xf32>
    %61 = arith.subf %60, %57 : vector<8x1xf32>
    %62 = arith.divf %59, %61 : vector<8x1xf32>
    %63 = math.log %62 : vector<8x1xf32>
    %cst_24 = arith.constant 5.000000e-01 : f32
    %64 = vector.broadcast %cst_24 : f32 to vector<8x1xf32>
    %65 = arith.mulf %64, %63 : vector<8x1xf32>
    %cst_25 = arith.constant 9.99999997E-7 : f32
    %66 = vector.broadcast %cst_25 : f32 to vector<8x1xf32>
    %67 = arith.maximumf %52, %66 : vector<8x1xf32>
    %68 = vector.broadcast %0 : f32 to vector<8x1xf32>
    %69 = arith.mulf %68, %67 : vector<8x1xf32>
    %70 = arith.divf %65, %69 : vector<8x1xf32>
    %71 = arith.mulf %53, %70 : vector<8x1xf32>
    %cst_26 = arith.constant 0.000000e+00 : f32
    %72 = vector.broadcast %cst_26 : f32 to vector<8x128xf32>
    %73 = arith.maximumf %30, %72 : vector<8x128xf32>
    %74 = arith.mulf %73, %73 : vector<8x128xf32>
    %cst_27 = arith.constant dense<0.000000e+00> : vector<8xf32>
    %75 = vector.multi_reduction <add>, %74, %cst_27 [1] : vector<8x128xf32> to vector<8xf32>
    %76 = vector.shape_cast %75 : vector<8xf32> to vector<8x1xf32>
    %77 = math.sqrt %76 : vector<8x1xf32>
    %78 = arith.mulf %71, %77 : vector<8x1xf32>
    %79 = vector.broadcast %0 : f32 to vector<8x1xf32>
    %80 = arith.mulf %79, %78 : vector<8x1xf32>
    %81 = math.tanh %80 : vector<8x1xf32>
    %cst_28 = arith.constant 9.99999997E-7 : f32
    %82 = vector.broadcast %cst_28 : f32 to vector<8x1xf32>
    %83 = arith.maximumf %78, %82 : vector<8x1xf32>
    %84 = vector.broadcast %0 : f32 to vector<8x1xf32>
    %85 = arith.mulf %84, %83 : vector<8x1xf32>
    %86 = arith.divf %81, %85 : vector<8x1xf32>
    %87 = arith.mulf %86, %78 : vector<8x1xf32>
    %88 = arith.mulf %71, %86 : vector<8x1xf32>
    %89 = vector.broadcast %0 : f32 to vector<8x1xf32>
    %90 = arith.mulf %89, %87 : vector<8x1xf32>
    %cst_29 = arith.constant 0.999998986 : f32
    %91 = vector.broadcast %cst_29 : f32 to vector<8x1xf32>
    %92 = arith.minimumf %90, %91 : vector<8x1xf32>
    %cst_30 = arith.constant 1.000000e+00 : f32
    %93 = vector.broadcast %cst_30 : f32 to vector<8x1xf32>
    %94 = arith.addf %93, %92 : vector<8x1xf32>
    %cst_31 = arith.constant 1.000000e+00 : f32
    %95 = vector.broadcast %cst_31 : f32 to vector<8x1xf32>
    %96 = arith.subf %95, %92 : vector<8x1xf32>
    %97 = arith.divf %94, %96 : vector<8x1xf32>
    %98 = math.log %97 : vector<8x1xf32>
    %cst_32 = arith.constant 5.000000e-01 : f32
    %99 = vector.broadcast %cst_32 : f32 to vector<8x1xf32>
    %100 = arith.mulf %99, %98 : vector<8x1xf32>
    %cst_33 = arith.constant 9.99999997E-7 : f32
    %101 = vector.broadcast %cst_33 : f32 to vector<8x1xf32>
    %102 = arith.maximumf %87, %101 : vector<8x1xf32>
    %103 = vector.broadcast %0 : f32 to vector<8x1xf32>
    %104 = arith.mulf %103, %102 : vector<8x1xf32>
    %105 = arith.divf %100, %104 : vector<8x1xf32>
    %106 = arith.mulf %88, %105 : vector<8x1xf32>
    %107 = vector.broadcast %106 : vector<8x1xf32> to vector<8x128xf32>
    %108 = arith.mulf %107, %73 : vector<8x128xf32>
    %c0_34 = arith.constant 0 : index
    %c0_35 = arith.constant 0 : index
    %109 = vector.load %arg4[%c0_34, %c0_35] : memref<128x128xf32, #tpu.memory_space<vmem>>, vector<128x128xf32>
    %cst_36 = arith.constant dense<0.000000e+00> : vector<8x128xf32>
    %110 = tpu.matmul %108, %109, %cst_36 {dimension_numbers = #tpu.dot_dimension_numbers<[1], [0], [0], [1], [0, 0, 1, 1], [], []>} : vector<8x128xf32>, vector<128x128xf32>, vector<8x128xf32> -> vector<8x128xf32>
    %111 = vector.broadcast %3 : vector<1x128xf32> to vector<8x128xf32>
    %112 = arith.addf %110, %111 : vector<8x128xf32>
    %113 = arith.mulf %112, %112 : vector<8x128xf32>
    %cst_37 = arith.constant dense<0.000000e+00> : vector<8xf32>
    %114 = vector.multi_reduction <add>, %113, %cst_37 [1] : vector<8x128xf32> to vector<8xf32>
    %115 = vector.shape_cast %114 : vector<8xf32> to vector<8x1xf32>
    %116 = math.sqrt %115 : vector<8x1xf32>
    %117 = vector.broadcast %0 : f32 to vector<8x1xf32>
    %118 = arith.mulf %117, %116 : vector<8x1xf32>
    %119 = math.tanh %118 : vector<8x1xf32>
    %cst_38 = arith.constant 9.99999997E-7 : f32
    %120 = vector.broadcast %cst_38 : f32 to vector<8x1xf32>
    %121 = arith.maximumf %116, %120 : vector<8x1xf32>
    %122 = vector.broadcast %0 : f32 to vector<8x1xf32>
    %123 = arith.mulf %122, %121 : vector<8x1xf32>
    %124 = arith.divf %119, %123 : vector<8x1xf32>
    %125 = arith.mulf %124, %116 : vector<8x1xf32>
    %cst_39 = arith.constant 9.990000e-01 : f32
    %126 = vector.broadcast %cst_39 : f32 to vector<8x1xf32>
    %127 = arith.cmpf ogt, %125, %126 : vector<8x1xf32>
    %cst_40 = arith.constant 9.99999997E-7 : f32
    %128 = vector.broadcast %cst_40 : f32 to vector<8x1xf32>
    %129 = arith.maximumf %125, %128 : vector<8x1xf32>
    %cst_41 = arith.constant 9.990000e-01 : f32
    %130 = vector.broadcast %cst_41 : f32 to vector<8x1xf32>
    %131 = arith.divf %130, %129 : vector<8x1xf32>
    %cst_42 = arith.constant 1.000000e+00 : f32
    %132 = vector.broadcast %cst_42 : f32 to vector<8x1xf32>
    %133 = arith.select %127, %131, %132 : vector<8x1xi1>, vector<8x1xf32>
    %134 = arith.mulf %124, %133 : vector<8x1xf32>
    %135 = vector.broadcast %134 : vector<8x1xf32> to vector<8x128xf32>
    %136 = arith.mulf %135, %112 : vector<8x128xf32>
    %c0_43 = arith.constant 0 : index
    %c0_44 = arith.constant 0 : index
    %137 = vector.load %arg6[%c0_43, %c0_44] : memref<8x128xf32, #tpu.memory_space<vmem>>, vector<8x128xf32>
    tpu.vector_store %arg6[%c0_43, %c0_44], %136 {strides = array<i32>} : memref<8x128xf32, #tpu.memory_space<vmem>>, vector<8x128xf32>,
    return
  }
  func.func @transform_0(%arg0: i32) -> (i32, i32) {
    %c0_i32 = arith.constant 0 : i32
    %c0_i32_0 = arith.constant 0 : i32
    return %arg0, %c0_i32 : i32, i32
  }
  func.func @transform_1(%arg0: i32) -> (i32, i32) {
    %c0_i32 = arith.constant 0 : i32
    %c0_i32_0 = arith.constant 0 : i32
    %c0_i32_1 = arith.constant 0 : i32
    return %c0_i32, %c0_i32_0 : i32, i32
  }
  func.func @transform_2(%arg0: i32) -> (i32, i32) {
    %c0_i32 = arith.constant 0 : i32
    %c0_i32_0 = arith.constant 0 : i32
    %c0_i32_1 = arith.constant 0 : i32
    return %c0_i32, %c0_i32_0 : i32, i32
  }
  func.func @transform_3(%arg0: i32) -> (i32, i32) {
    %c0_i32 = arith.constant 0 : i32
    %c0_i32_0 = arith.constant 0 : i32
    %c0_i32_1 = arith.constant 0 : i32
    return %c0_i32, %c0_i32_0 : i32, i32
  }
  func.func @transform_4(%arg0: i32) -> (i32, i32) {
    %c0_i32 = arith.constant 0 : i32
    %c0_i32_0 = arith.constant 0 : i32
    %c0_i32_1 = arith.constant 0 : i32
    return %c0_i32, %c0_i32_0 : i32, i32
  }
  func.func @transform_5(%arg0: i32) -> (i32, i32) {
    %c0_i32 = arith.constant 0 : i32
    %c0_i32_0 = arith.constant 0 : i32
    return %arg0, %c0_i32 : i32, i32
  }
}

</mosaic_0001>

<bundles_post_ra>
// kernel: tpu_custom_call.1
= control target key start
LH: loop header
LB: loop body
LE: loop exit
PB: predicated region body
PF: predicated region fallthrough
CT: control target
= control target key end

     0   :  { %10 = vsyncpa [#allocation3], 0  ;;  %s1323_s0 = inlined_call_operand.hbm [shape: f32[16,128], index: 0, kind: input, shape index: {}]   ;;  %s1324_s1 = inlined_call_operand.hbm [shape: f32[128,128], index: 1, kind: input, shape index: {}]   ;;  %s1325_s2 = inlined_call_operand.vmem [shape: f32[1,128], index: 2, kind: input, shape index: {}]   ;;  %s1326_s3 = inlined_call_operand.hbm [shape: f32[128,128], index: 3, kind: input, shape index: {}]   ;;  %s1327_s4 = inlined_call_operand.vmem [shape: f32[1,128], index: 4, kind: input, shape index: {}]   ;;  %s1328_s5 = inlined_call_operand.hbm [shape: f32[16,128], index: 5, kind: output, shape index: {}]  }
   0x1   :  { %12 = vsyncpa [#allocation3 + $0x1], 0 }
   0x2   :  { %13 = vsyncpa [#allocation6], 0 }
   0x3   :  { %14 = vsyncpa [#allocation4], 0 }
   0x4   :  { %16 = vsyncpa [#allocation4 + $0x1], 0  ;;  %s1104_s18 = smov 0   ;;  %s1106_s19 = smov 0  }
   0x5   :  { %s1108_s20 = smov 0   ;;  %s1110_s21 = smov 0  }
   0x6 LB: > { %s1125_s22 = sadd.s32 4294967295, %s1064_s21   ;;  %s681_s23 = sadd.s32 4294967294, %s1064_s21   ;;  %s1064_s21 = sphi %s1110_s21, %s1350_s21   ;;  %s1060_s20 = sphi %s1108_s20, %s1349_s20   ;;  %s1056_s19 = sphi %s1106_s19, %s1348_s19   ;;  %s1052_s18 = sphi %s1104_s18, %s1347_s18  }
   0x7   : > { %p42_p0 = scmp.ne.s32.totalorder %s1056_s19, %s1052_s18  ;;  %p1329_p1 = scmp.eq.s32.totalorder %s1125_s22, 0 }
   0x8   : > { %p156_p3 = scmp.eq.s32.totalorder %s681_s23, 1  ;;  %p682_p5 = scmp.ge.s32.totalorder %s1064_s21, 1 }
   0x9   : > { %p1134_p4 = por %p1329_p1, %p42_p0  ;;  %p163_p7 = scmp.lt.s32.totalorder %s1064_s21, 3 }
   0xa   : > { %p1139_p6 = por %p156_p3, %p42_p0  ;;  %s1066_s27 = smov [#allocation5]  }
   0xb   : > { %s1333_s24 = scalar_select %p1134_p4, 1, 0 }
   0xc   : > { %s1334_s25 = scalar_select %p1139_p6, 1, 0 }
   0xd   : > { %p1144_p8 = pnand %p682_p5, %p163_p7  ;;  %s175_s28 = sshll.u32 %s1066_s27, 4  ;;  %s176_s28 = int_to_ptr.vmem [resolvable:$true] %s175_s28 }
   0xe   : > { %s1067_s30 = smov [#allocation7]   ;;  %s927_s7 = scalar_lea.vmem %s176_s28, 2048 }
   0xf   : > { %s1335_s26 = scalar_select %p1144_p8, 1, 0 }
  0x10   : > { %p815_p9 = pneg %p1144_p8  ;;  %s191_s6 = sshll.u32 %s1067_s30, 4  ;;  %s192_s6 = int_to_ptr.vmem [resolvable:$true] %s191_s6 }
  0x11   : > { %p928_p13 = scmp.ne.s32.totalorder %s176_s28, %s927_s7  ;;  %p935_p5 = scmp.lt.s32.totalorder %s176_s28, %s176_s28 }
  0x12   : > { %p1153_p11 = pnand %p815_p9, %p1329_p1  ;;  %p936_p7 = scmp.lt.s32.totalorder %s927_s7, %s927_s7 }
  0x14   : > { %p918_p12 = pneg %p1153_p11  ;;  %p937_p10 = por %p936_p7, %p935_p5 }
  0x16   : > { %p930_p0 = pnand %p928_p13, %p918_p12 }
  0x18   : > { %p931_p3 = pneg %p930_p0 }
  0x1a   : > { %p938_p9 = pnand %p937_p10, %p931_p3 }
  0x1c   : > { %941 = shalt.err (!%p938_p9)
}
  0x1d   : > { %s1068_s8 = smov 128   ;;  %s1069_s9 = smov 8  }
  0x1e   : > { %818 = dma.hbm_to_vmem [thread:$0]  (!%p1153_p11), %s1324_s1, 2048, %s176_s28, [#allocation6], %s1068_s8, %s1068_s8, %s1069_s9  }
  0x1f   : > { %s953_s12 = scalar_lea.vmem %s192_s6, 2048  ;;  %p961_p2 = scmp.lt.s32.totalorder %s192_s6, %s192_s6 }
  0x20   : > { %p954_p1 = scmp.ne.s32.totalorder %s192_s6, %s953_s12  ;;  %p962_p6 = scmp.lt.s32.totalorder %s953_s12, %s953_s12 }
  0x22   : > { %p956_p13 = pnand %p954_p1, %p918_p12  ;;  %p963_p5 = por %p962_p6, %p961_p2 }
  0x24   : > { %p957_p0 = pneg %p956_p13 }
  0x26   : > { %p964_p10 = pnand %p963_p5, %p957_p0 }
  0x28   : > { %967 = shalt.err (!%p964_p10)
}
  0x29   : > { %821 = dma.hbm_to_vmem [thread:$0]  (!%p1153_p11), %s1326_s3, 2048, %s192_s6, [#allocation6], %s1068_s8, %s1068_s8, %s1069_s9  }
  0x2a   : > { %s1176_s15 = sadd.s32 1, %s1064_s21   ;;  %s29_s16 = sadd.s32 1, %s1060_s20 }
  0x2b   : > { %s26_s17 = ssub.s32 %s1064_s21, %s1176_s15  ;;  %p36_p1 = scmp.ne.s32.totalorder %s1060_s20, %s1056_s19 }
  0x2c   : > { %p27_p2 = scmp.eq.s32.totalorder %s26_s17, 0  ;;  %p37_p6 = scmp.eq.s32.totalorder %s1064_s21, 0 }
  0x2d   : > { %p1337_p12 = scmp.eq.s32.totalorder %s1125_s22, 1  ;;  %p832_p7 = scmp.lt.s32.totalorder %s1064_s21, 2 }
  0x2e   : > { %s1192_s27 = scalar_select %p27_p2, %s1060_s20, %s29_s16  }
  0x2f   : > { %p1186_p3 = por %p1337_p12, %p36_p1  ;;  %p38_p9 = por %p37_p6, %p36_p1 }
  0x30   : > { %s208_s28 = sand.u32 1, %s1060_s20   ;;  %s687_s30 = sshll.u32 %s1064_s21, 7 }
  0x31   : > { %s1338_s23 = scalar_select %p1186_p3, 1, 0 }
  0x32   : > { %s686_s29 = sshll.u32 %s208_s28, 3  ;;  %s1199_s8 = scalar_lea.hbm %s1323_s0, %s687_s30 }
  0x33   : > { %s212_s9 = scalar_lea.vmem [#allocation2], %s686_s29  ;;  %p1201_p11 = pnand %p832_p7, %p38_p9 }
  0x34   : > { %s219_s10 = sshll.u32 %s212_s9, 4  ;;  %s209_s12 = scalar_lea.sflag [#allocation3], %s208_s28  ;;  %s220_s10 = int_to_ptr.vmem [resolvable:$true] %s219_s10 }
  0x35   : > { %s968_s13 = scalar_lea.hbm %s1199_s8, 128  ;;  %p970_p0 = pneg %p1201_p11 }
  0x36   : > { %p969_p13 = scmp.ne.s32.totalorder %s1199_s8, %s968_s13  ;;  %s973_s17 = scalar_lea.hbm %s1323_s0, 256 }
  0x37   : > { %p974_p1 = scmp.lt.s32.totalorder %s1199_s8, %s1323_s0  ;;  %p975_p2 = scmp.lt.s32.totalorder %s973_s17, %s968_s13 }
  0x38   : > { %p971_p5 = pnand %p970_p0, %p969_p13 }
  0x39   : > { %p976_p6 = por %p975_p2, %p974_p1 }
  0x3a   : > { %p972_p10 = pneg %p971_p5 }
  0x3c   : > { %p977_p12 = pnand %p976_p6, %p972_p10 }
  0x3e   : > { %980 = shalt.err (!%p977_p12)
}
  0x3f   : > { %s981_s6 = scalar_lea.vmem %s220_s10, 128  ;;  %s1070_s28 = smov [#allocation2]  }
  0x40   : > { %p982_p7 = scmp.ne.s32.totalorder %s220_s10, %s981_s6  ;;  %s986_s7 = sshll.u32 %s1070_s28, 4  ;;  %s987_s7 = int_to_ptr.vmem [resolvable:$false] %s986_s7 }
  0x41   : > { %s988_s9 = scalar_lea.vmem %s987_s7, 256  ;;  %p989_p13 = scmp.lt.s32.totalorder %s220_s10, %s987_s7 }
  0x42   : > { %p984_p9 = pnand %p982_p7, %p970_p0  ;;  %p990_p5 = scmp.lt.s32.totalorder %s988_s9, %s981_s6 }
  0x44   : > { %p985_p3 = pneg %p984_p9  ;;  %p991_p4 = por %p990_p5, %p989_p13 }
  0x46   : > { %p992_p8 = pnand %p991_p4, %p985_p3 }
  0x48   : > { %995 = shalt.err (!%p992_p8)
}
  0x49   : > { %825 = dma.hbm_to_vmem [thread:$0]  (!%p1201_p11), %s1199_s8, 128, %s220_s10, %s209_s12  }
  0x4a   : > { %p1340_p10 = scmp.ne.s32.totalorder %s1335_s26, 0 }
  0x4b   : > { %s1222_s13 = sand.u32 (!%p1340_p10), 1, %s1056_s19   ;;  %p1341_p4 = scmp.ne.s32.totalorder (!%p1340_p10), %s1333_s24, 0 }
  0x4c   : > { %228 = sbr.rel (%p1340_p10) target bundleno = 1209 (0x4b9), region = 40  ;;  %s689_s14 = sshll.u32 (!%p1340_p10), %s1222_s13, 3 }
  0x4d   : > { %s231_s16 = scalar_lea.sflag (!%p1340_p10), [#allocation3], %s1222_s13  ;;  %s234_s17 = scalar_lea.vmem (!%p1340_p10), [#allocation2], %s689_s14 }
  0x51   : > { %1039 = dma.done.wait (%p1341_p4), %s231_s16, 128  }
  0x52   : > { %1041 = vsyncadd (%p1341_p4), %s231_s16, 4294967168  ;;  %p1342_p8 = scmp.eq.s32.totalorder %s1125_s22, 0 }
  0x54   : > { %1043 = dma.done.wait (%p1342_p8), [#allocation6], 4096   ;;  %p1343_p3 = pmov %p1342_p8 }
  0x55   : > { %v1236_v0 = vld [vmem:[%s234_s17] sm:$0xff]  ;;  %v1071_v3 = vmov 0.0   ;;  %vm1072_vm0 = vmmov 0   ;;  %v309_v5 = vld [vmem:[#allocation5 + $0x68] sm:$0xff]  ;;  %v308_v6 = vld [vmem:[#allocation5 + $0x60] sm:$0xff]  ;;  %s696_s11 = sshll.u32 %s1125_s22, 7 }
  0x56   : > { %1045 = vsyncadd (%p1343_p3), [#allocation6], 4294963200  ;;  %v272_v1 = vmul.f32 %v1236_v0, %v1236_v0  ;;  %v311_v2 = vld [vmem:[#allocation5 + $0x78] sm:$0xff]  ;;  %733 = vmatprep.subr.mxu0 %v1071_v3  ;;  %v310_v4 = vld [vmem:[#allocation5 + $0x70] sm:$0xff]  ;;  %765 = vmatprep.mubr.msk.f32.mxu0 %vm1072_vm0, %v1071_v3  ;;  %s268_s12 = scalar_lea.vmem [#allocation8], %s689_s14  ;;  %s590_s28 = scalar_lea.hbm %s1328_s5, %s696_s11 }
  0x57   : > { %734 = vmatpush3.msra.mxu0 %v311_v2  ;;  %768 = vmatprep.subr.mxu1 %v1071_v3  ;;  %v307_v7 = vld [vmem:[#allocation5 + $0x58] sm:$0xff]  ;;  %v306_v8 = vld [vmem:[#allocation5 + $0x50] sm:$0xff]  ;;  %v305_v9 = vld [vmem:[#allocation5 + $0x48] sm:$0xff]  ;;  %s592_s30 = sshll.u32 %s268_s12, 4  ;;  %s579_s7 = scalar_lea.sflag [#allocation4], %s1222_s13  ;;  %s593_s30 = int_to_ptr.vmem [resolvable:$true] %s592_s30 }
  0x58   : > { %273 = vadd.xlane.f32.xlu0 %v272_v1  ;;  %735 = vmatprep.subr.mxu0 %v1071_v3  ;;  %v304_v10 = vld [vmem:[#allocation5 + $0x40] sm:$0xff]  ;;  %v303_v11 = vld [vmem:[#allocation5 + $0x38] sm:$0xff]  ;;  %v302_v12 = vld [vmem:[#allocation5 + $0x30] sm:$0xff]  ;;  %s996_s9 = scalar_lea.vmem %s593_s30, 128  ;;  %p1344_p0 = scmp.ne.s32.totalorder %s1338_s23, 0 }
  0x59   : > { %800 = vmatprep.mubr.msk.f32.mxu1 %vm1072_vm0, %v1071_v3  ;;  %736 = vmatpush3.msra.mxu0 %v310_v4  ;;  %v301_v13 = vld [vmem:[#allocation5 + $0x28] sm:$0xff]  ;;  %v300_v14 = vld [vmem:[#allocation5 + $0x20] sm:$0xff]  ;;  %v299_v15 = vld [vmem:[#allocation5 + $0x18] sm:$0xff]  ;;  %p997_p11 = scmp.ne.s32.totalorder %s593_s30, %s996_s9  ;;  %s1073_s16 = smov [#allocation8]  }
  0x5a   : > { %737 = vmatprep.subr.mxu0 %v1071_v3  ;;  %v298_v16 = vld [vmem:[#allocation5 + $0x10] sm:$0xff]  ;;  %v297_v17 = vld [vmem:[#allocation5 + $0x8] sm:$0xff]  ;;  %v296_v18 = vld [vmem:[#allocation5] sm:$0xff]  ;;  %s1000_s17 = sshll.u32 %s1073_s16, 4  ;;  %s1001_s17 = int_to_ptr.vmem [resolvable:$false] %s1000_s17 }
  0x5b   : > { %738 = vmatpush3.msra.mxu0 %v309_v5  ;;  %v693_v39 = vld [vmem:[%s1325_s2] ss:$0 sm:$0xff]  ;;  %v476_v46 = vld [vmem:[#allocation7 + $0x78] sm:$0xff]  ;;  %v474_v48 = vld [vmem:[#allocation7 + $0x68] sm:$0xff]  ;;  %p998_p1 = pnand %p997_p11, %p1344_p0  ;;  %s1002_s22 = scalar_lea.vmem %s1001_s17, 256 }
  0x5c   : > { %739 = vmatprep.subr.mxu0 %v1071_v3  ;;  %v475_v47 = vld [vmem:[#allocation7 + $0x70] sm:$0xff]  ;;  %769 = vmatpush3.msra.mxu1 %v476_v46  ;;  %v473_v49 = vld [vmem:[#allocation7 + $0x60] sm:$0xff]  ;;  %v472_v50 = vld [vmem:[#allocation7 + $0x58] sm:$0xff]  ;;  %p1003_p6 = scmp.lt.s32.totalorder %s593_s30, %s1001_s17  ;;  %p1004_p12 = scmp.lt.s32.totalorder %s1002_s22, %s996_s9 }
  0x5d   : > { %740 = vmatpush3.msra.mxu0 %v308_v6  ;;  %770 = vmatprep.subr.mxu1 %v1071_v3  ;;  %v471_v51 = vld [vmem:[#allocation7 + $0x50] sm:$0xff]  ;;  %v470_v52 = vld [vmem:[#allocation7 + $0x48] sm:$0xff]  ;;  %v469_v53 = vld [vmem:[#allocation7 + $0x40] sm:$0xff]  ;;  %p999_p2 = pneg %p998_p1 }
  0x5e   : > { %741 = vmatprep.subr.mxu0 %v1071_v3  ;;  %771 = vmatpush3.msra.mxu1 %v475_v47  ;;  %v468_v54 = vld [vmem:[#allocation7 + $0x38] sm:$0xff]  ;;  %v467_v55 = vld [vmem:[#allocation7 + $0x30] sm:$0xff]  ;;  %v466_v56 = vld [vmem:[#allocation7 + $0x28] sm:$0xff]  ;;  %p1005_p7 = por %p1004_p12, %p1003_p6 }
  0x5f   : > { %742 = vmatpush3.msra.mxu0 %v307_v7  ;;  %772 = vmatprep.subr.mxu1 %v1071_v3  ;;  %v465_v57 = vld [vmem:[#allocation7 + $0x20] sm:$0xff]  ;;  %v464_v58 = vld [vmem:[#allocation7 + $0x18] sm:$0xff]  ;;  %v463_v59 = vld [vmem:[#allocation7 + $0x10] sm:$0xff] }
  0x60   : > { %743 = vmatprep.subr.mxu0 %v1071_v3  ;;  %773 = vmatpush3.msra.mxu1 %v474_v48  ;;  %v462_v60 = vld [vmem:[#allocation7 + $0x8] sm:$0xff]  ;;  %v461_v61 = vld [vmem:[#allocation7] sm:$0xff]  ;;  %p1006_p9 = pnand %p1005_p7, %p999_p2 }
  0x61   : > { %744 = vmatpush3.msra.mxu0 %v306_v8  ;;  %774 = vmatprep.subr.mxu1 %v1071_v3 }
  0x62   : > { %745 = vmatprep.subr.mxu0 %v1071_v3  ;;  %775 = vmatpush3.msra.mxu1 %v473_v49 }
  0x63   : > { %746 = vmatpush3.msra.mxu0 %v305_v9  ;;  %776 = vmatprep.subr.mxu1 %v1071_v3 }
  0x64   : > { %747 = vmatprep.subr.mxu0 %v1071_v3  ;;  %777 = vmatpush3.msra.mxu1 %v472_v50 }
  0x65   : > { %748 = vmatpush3.msra.mxu0 %v304_v10  ;;  %778 = vmatprep.subr.mxu1 %v1071_v3 }
  0x66   : > { %749 = vmatprep.subr.mxu0 %v1071_v3  ;;  %779 = vmatpush3.msra.mxu1 %v471_v51 }
  0x67   : > { %750 = vmatpush3.msra.mxu0 %v303_v11  ;;  %780 = vmatprep.subr.mxu1 %v1071_v3 }
  0x68   : > { %751 = vmatprep.subr.mxu0 %v1071_v3  ;;  %781 = vmatpush3.msra.mxu1 %v470_v52 }
  0x69   : > { %752 = vmatpush3.msra.mxu0 %v302_v12  ;;  %782 = vmatprep.subr.mxu1 %v1071_v3 }
  0x6a   : > { %753 = vmatprep.subr.mxu0 %v1071_v3  ;;  %783 = vmatpush3.msra.mxu1 %v469_v53 }
  0x6b   : > { %754 = vmatpush3.msra.mxu0 %v301_v13  ;;  %784 = vmatprep.subr.mxu1 %v1071_v3 }
  0x6c   : > { %755 = vmatprep.subr.mxu0 %v1071_v3  ;;  %785 = vmatpush3.msra.mxu1 %v468_v54 }
  0x6d   : > { %756 = vmatpush3.msra.mxu0 %v300_v14  ;;  %786 = vmatprep.subr.mxu1 %v1071_v3 }
  0x6e   : > { %757 = vmatprep.subr.mxu0 %v1071_v3  ;;  %787 = vmatpush3.msra.mxu1 %v467_v55 }
  0x6f   : > { %758 = vmatpush3.msra.mxu0 %v299_v15  ;;  %788 = vmatprep.subr.mxu1 %v1071_v3 }
  0x70   : > { %759 = vmatprep.subr.mxu0 %v1071_v3  ;;  %789 = vmatpush3.msra.mxu1 %v466_v56 }
  0x71   : > { %760 = vmatpush3.msra.mxu0 %v298_v16  ;;  %790 = vmatprep.subr.mxu1 %v1071_v3 }
  0x72   : > { %761 = vmatprep.subr.mxu0 %v1071_v3  ;;  %791 = vmatpush3.msra.mxu1 %v465_v57 }
  0x73   : > { %762 = vmatpush3.msra.mxu0 %v297_v17  ;;  %792 = vmatprep.subr.mxu1 %v1071_v3 }
  0x74   : > { %763 = vmatprep.subr.mxu0 %v1071_v3  ;;  %793 = vmatpush3.msra.mxu1 %v464_v58 }
  0x75   : > { %764 = vmatpush3.msra.mxu0 %v296_v18  ;;  %794 = vmatprep.subr.mxu1 %v1071_v3 }
  0x76   : > { %795 = vmatpush3.msra.mxu1 %v463_v59 }
  0x77   : > { %796 = vmatprep.subr.mxu1 %v1071_v3 }
  0x78   : > { %797 = vmatpush3.msra.mxu1 %v462_v60 }
  0x79   : > { %798 = vmatprep.subr.mxu1 %v1071_v3 }
  0x7a   : > { %799 = vmatpush3.msra.mxu1 %v461_v61 }
  0xe1   : > { %v274_v19 = vpop.xlane.xlu0 %273 }
  0xe2   : > { %874 = vrsqrt.f32 %v274_v19  ;;  %vm277_vm1 = vcmp.eq.f32.partialorder %v274_v19, inf  ;;  %v280_v22 = vand.u32 2147483648, %v274_v19  ;;  %vm279_vm2 = vcmp.eq.f32.partialorder %v274_v19, 0.0 }
  0xef   : > { %v875_v20 = vpop.eup %874 }
  0xf0   : > { %v276_v21 = vmul.f32 %v875_v20, %v274_v19 }
  0xf2   : > { %v278_v23 = vsel %vm277_vm1, %v274_v19, %v276_v21 }
  0xf3   : > { %v281_v24 = vsel %vm279_vm2, %v280_v22, %v278_v23 }
  0xf4   : > { %v282_v25 = vmul.f32 0.2236068, %v281_v24  ;;  %v291_v28 = vmax.f32 %v281_v24, 1e-06 }
  0xf6   : > { %v283_v26 = vmin.f32 %v282_v25, 0.999999  ;;  %v292_v32 = vmul.f32 0.2236068, %v291_v28 }
  0xf8   : > { %v285_v27 = vsub.f32 1.0, %v283_v26  ;;  %v284_v29 = vadd.f32 1.0, %v283_v26 }
  0xfa   : > { %876 = vrcp.f32 %v285_v27 }
 0x107   : > { %v877_v30 = vpop.eup %876 }
 0x108   : > { %v287_v31 = vmul.f32 %v877_v30, %v284_v29 }
 0x10a   : > { %878 = vlog2.f32 %v287_v31 }
 0x10b   : > { %880 = vrcp.f32 %v292_v32 }
 0x117   : > { %v879_v33 = vpop.eup %878 }
 0x118   : > { %v289_v34 = vmul.f32 0.6931472, %v879_v33  ;;  %v881_v36 = vpop.eup %880 }
 0x11a   : > { %v290_v35 = vmul.f32 0.5, %v289_v34 }
 0x11c   : > { %v294_v37 = vmul.f32 %v881_v36, %v290_v35 }
 0x11e   : > { %v295_v38 = vmul.f32 %v294_v37, %v1236_v0 }
 0x120   : > { %766 = vmatmul.mubr.f32.vlgmr.msra.gmra.mxu0 %v295_v38 }
 0x1e0   : > { %v384_v40 = vpop.f32.mrf.mxu0 }
 0x1e1   : > { %v385_v41 = vadd.f32 %v693_v39, %v384_v40 }
 0x1e2   : > { %v767_v42 = vpop.f32.mrf.mxu0 }
 0x1e3   : > { %v388_v43 = vmul.f32 %v385_v41, %v385_v41  ;;  %v1263_v44 = vmax.f32 %v385_v41, 0.0 }
 0x1e5   : > { %389 = vadd.xlane.f32.xlu0 %v388_v43  ;;  %v427_v45 = vmul.f32 %v1263_v44, %v1263_v44 }
 0x1e7   : > { %428 = vadd.xlane.f32.xlu1 %v427_v45 }
 0x26e   : > { %v390_v62 = vpop.xlane.xlu0 %389 }
 0x26f   : > { %882 = vrsqrt.f32 %v390_v62  ;;  %vm393_vm3 = vcmp.eq.f32.partialorder %v390_v62, inf  ;;  %v396_v1 = vand.u32 2147483648, %v390_v62  ;;  %vm395_vm4 = vcmp.eq.f32.partialorder %v390_v62, 0.0 }
 0x270   : > { %v429_v19 = vpop.xlane.xlu1 %428 }
 0x271   : > { %vm432_vm6 = vcmp.eq.f32.partialorder %v429_v19, inf  ;;  %v435_v34 = vand.u32 2147483648, %v429_v19  ;;  %vm434_vm7 = vcmp.eq.f32.partialorder %v429_v19, 0.0 }
 0x27c   : > { %v883_v63 = vpop.eup %882 }
 0x27d   : > { %v392_v0 = vmul.f32 %v883_v63, %v390_v62 }
 0x27f   : > { %v394_v2 = vsel %vm393_vm3, %v390_v62, %v392_v0  ;;  %v694_v62 = vld [vmem:[%s1327_s4] ss:$0 sm:$0xff] }
 0x280   : > { %v397_v4 = vsel %vm395_vm4, %v396_v1, %v394_v2 }
 0x281   : > { %v398_v5 = vmul.f32 0.2236068, %v397_v4  ;;  %v400_v6 = vmax.f32 %v397_v4, 1e-06 }
 0x283   : > { %v401_v7 = vmul.f32 0.2236068, %v400_v6  ;;  %884 = vtanh.f32 %v398_v5 }
 0x285   : > { %886 = vrcp.f32 %v401_v7 }
 0x290   : > { %v885_v8 = vpop.eup %884 }
 0x292   : > { %v887_v9 = vpop.eup %886 }
 0x293   : > { %v403_v10 = vmul.f32 %v887_v9, %v885_v8 }
 0x295   : > { %v404_v11 = vmul.f32 %v403_v10, %v397_v4 }
 0x297   : > { %v406_v3 = vmax.f32 %v404_v11, 1e-06  ;;  %vm405_vm5 = vcmp.gt.f32.partialorder %v404_v11, 0.999 }
 0x299   : > { %888 = vrcp.f32 %v406_v3 }
 0x2a6   : > { %v889_v12 = vpop.eup %888 }
 0x2a7   : > { %v408_v13 = vmul.f32 0.999, %v889_v12 }
 0x2a9   : > { %v409_v14 = vsel %vm405_vm5, %v408_v13, 1.0 }
 0x2aa   : > { %v410_v15 = vmul.f32 %v409_v14, %v404_v11  ;;  %v411_v32 = vmul.f32 %v409_v14, %v403_v10 }
 0x2ac   : > { %v412_v16 = vmul.f32 0.2236068, %v410_v15  ;;  %v421_v21 = vmax.f32 %v410_v15, 1e-06 }
 0x2ae   : > { %v413_v17 = vmin.f32 %v412_v16, 0.999999  ;;  %v422_v24 = vmul.f32 0.2236068, %v421_v21 }
 0x2b0   : > { %v415_v18 = vsub.f32 1.0, %v413_v17  ;;  %v414_v20 = vadd.f32 1.0, %v413_v17 }
 0x2b2   : > { %890 = vrcp.f32 %v415_v18 }
 0x2b3   : > { %892 = vrsqrt.f32 %v429_v19 }
 0x2bf   : > { %v891_v22 = vpop.eup %890 }
 0x2c0   : > { %v417_v23 = vmul.f32 %v891_v22, %v414_v20  ;;  %v893_v25 = vpop.eup %892 }
 0x2c1   : > { %v431_v27 = vmul.f32 %v893_v25, %v429_v19 }
 0x2c2   : > { %894 = vlog2.f32 %v417_v23 }
 0x2c3   : > { %896 = vrcp.f32 %v422_v24  ;;  %v433_v31 = vsel %vm432_vm6, %v429_v19, %v431_v27 }
 0x2c4   : > { %v436_v36 = vsel %vm434_vm7, %v435_v34, %v433_v31 }
 0x2cf   : > { %v895_v26 = vpop.eup %894 }
 0x2d0   : > { %v419_v28 = vmul.f32 0.6931472, %v895_v26  ;;  %v897_v30 = vpop.eup %896 }
 0x2d2   : > { %v420_v29 = vmul.f32 0.5, %v419_v28 }
 0x2d4   : > { %v424_v33 = vmul.f32 %v897_v30, %v420_v29 }
 0x2d6   : > { %v425_v35 = vmul.f32 %v424_v33, %v411_v32 }
 0x2d8   : > { %v437_v37 = vmul.f32 %v436_v36, %v425_v35 }
 0x2da   : > { %v438_v38 = vmul.f32 0.2236068, %v437_v37  ;;  %v440_v39 = vmax.f32 %v437_v37, 1e-06 }
 0x2dc   : > { %v441_v40 = vmul.f32 0.2236068, %v440_v39  ;;  %898 = vtanh.f32 %v438_v38 }
 0x2de   : > { %900 = vrcp.f32 %v441_v40 }
 0x2e9   : > { %v899_v41 = vpop.eup %898 }
 0x2eb   : > { %v901_v42 = vpop.eup %900 }
 0x2ec   : > { %v443_v43 = vmul.f32 %v901_v42, %v899_v41 }
 0x2ee   : > { %v444_v45 = vmul.f32 %v443_v43, %v437_v37  ;;  %v445_v46 = vmul.f32 %v443_v43, %v425_v35 }
 0x2f0   : > { %v446_v47 = vmul.f32 0.2236068, %v444_v45  ;;  %v455_v51 = vmax.f32 %v444_v45, 1e-06 }
 0x2f2   : > { %v447_v48 = vmin.f32 %v446_v47, 0.999999  ;;  %v456_v54 = vmul.f32 0.2236068, %v455_v51 }
 0x2f4   : > { %v449_v49 = vsub.f32 1.0, %v447_v48  ;;  %v448_v50 = vadd.f32 1.0, %v447_v48 }
 0x2f6   : > { %902 = vrcp.f32 %v449_v49 }
 0x303   : > { %v903_v52 = vpop.eup %902 }
 0x304   : > { %v451_v53 = vmul.f32 %v903_v52, %v448_v50 }
 0x306   : > { %904 = vlog2.f32 %v451_v53 }
 0x307   : > { %906 = vrcp.f32 %v456_v54 }
 0x313   : > { %v905_v55 = vpop.eup %904 }
 0x314   : > { %v453_v56 = vmul.f32 0.6931472, %v905_v55  ;;  %v907_v58 = vpop.eup %906 }
 0x316   : > { %v454_v57 = vmul.f32 0.5, %v453_v56 }
 0x318   : > { %v458_v59 = vmul.f32 %v907_v58, %v454_v57 }
 0x31a   : > { %v459_v60 = vmul.f32 %v458_v59, %v445_v46 }
 0x31c   : > { %v460_v61 = vmul.f32 %v459_v60, %v1263_v44 }
 0x31e   : > { %801 = vmatmul.mubr.f32.vlgmr.msra.gmra.mxu1 %v460_v61 }
 0x3de   : > { %v549_v63 = vpop.f32.mrf.mxu1 }
 0x3df   : > { %v550_v0 = vadd.f32 %v694_v62, %v549_v63 }
 0x3e0   : > { %v802_v1 = vpop.f32.mrf.mxu1 }
 0x3e1   : > { %v553_v2 = vmul.f32 %v550_v0, %v550_v0 }
 0x3e3   : > { %554 = vadd.xlane.f32.xlu1 %v553_v2 }
 0x46c   : > { %v555_v4 = vpop.xlane.xlu1 %554 }
 0x46d   : > { %908 = vrsqrt.f32 %v555_v4  ;;  %vm558_vm8 = vcmp.eq.f32.partialorder %v555_v4, inf  ;;  %v561_v7 = vand.u32 2147483648, %v555_v4  ;;  %vm560_vm9 = vcmp.eq.f32.partialorder %v555_v4, 0.0 }
 0x47a   : > { %v909_v5 = vpop.eup %908 }
 0x47b   : > { %v557_v6 = vmul.f32 %v909_v5, %v555_v4 }
 0x47d   : > { %v559_v8 = vsel %vm558_vm8, %v555_v4, %v557_v6 }
 0x47e   : > { %v562_v9 = vsel %vm560_vm9, %v561_v7, %v559_v8 }
 0x47f   : > { %v563_v44 = vmul.f32 0.2236068, %v562_v9  ;;  %v565_v10 = vmax.f32 %v562_v9, 1e-06 }
 0x481   : > { %v566_v11 = vmul.f32 0.2236068, %v565_v10  ;;  %910 = vtanh.f32 %v563_v44 }
 0x483   : > { %912 = vrcp.f32 %v566_v11 }
 0x48e   : > { %v911_v3 = vpop.eup %910 }
 0x490   : > { %v913_v12 = vpop.eup %912 }
 0x491   : > { %v568_v13 = vmul.f32 %v913_v12, %v911_v3 }
 0x493   : > { %v569_v14 = vmul.f32 %v568_v13, %v562_v9 }
 0x495   : > { %v571_v15 = vmax.f32 %v569_v14, 1e-06  ;;  %vm570_vm10 = vcmp.gt.f32.partialorder %v569_v14, 0.999 }
 0x497   : > { %914 = vrcp.f32 %v571_v15 }
 0x4a4   : > { %v915_v16 = vpop.eup %914 }
 0x4a5   : > { %v573_v17 = vmul.f32 0.999, %v915_v16 }
 0x4a7   : > { %v574_v18 = vsel %vm570_vm10, %v573_v17, 1.0 }
 0x4a8   : > { %v575_v19 = vmul.f32 %v574_v18, %v568_v13 }
 0x4aa   : > { %v576_v20 = vmul.f32 %v575_v19, %v550_v0 }
 0x4ac   : > { %577 = vst [vmem:[%s268_s12] sm:$0xff] %v576_v20 }
 0x4ad   : > { %1009 = shalt.err (!%p1006_p9)
}
 0x4ae   : > { %s1010_s14 = scalar_lea.hbm %s590_s28, 128  ;;  %s1014_s26 = scalar_lea.hbm %s1328_s5, 256 }
 0x4af   : > { %p1011_p13 = scmp.ne.s32.totalorder %s590_s28, %s1010_s14  ;;  %p1015_p4 = scmp.lt.s32.totalorder %s590_s28, %s1328_s5 }
 0x4b0   : > { %p1016_p8 = scmp.lt.s32.totalorder %s1014_s26, %s1010_s14 }
 0x4b1   : > { %p1012_p5 = pnand %p1011_p13, %p1344_p0 }
 0x4b2   : > { %p1017_p3 = por %p1016_p8, %p1015_p4 }
 0x4b3   : > { %p1013_p10 = pneg %p1012_p5 }
 0x4b5   : > { %p1018_p11 = pnand %p1017_p3, %p1013_p10 }
 0x4b7   : > { %1021 = shalt.err (!%p1018_p11)
}
 0x4b8   : > { %813 = dma.vmem_to_hbm [thread:$0]  (%p1344_p0), %s593_s30, 128, %s590_s28, %s579_s7  }
 0x4b9 PF: > { %s604_s11 = sand.u32 1, %s1052_s18   ;;  %p1345_p1 = scmp.ne.s32.totalorder %s1334_s25, 0 }
 0x4ba   : > { %p1346_p2 = scmp.ge.s32.totalorder %s1064_s21, 2  ;;  %s605_s12 = scalar_lea.sflag [#allocation4], %s604_s11 }
 0x4bc   : > { %p827_p6 = pnand %p1346_p2, %p1345_p1 }
 0x4be   : > { %p828_p12 = pneg %p827_p6 }
 0x4c0   : > { %1047 = dma.done.wait (%p828_p12), %s605_s12, 128  }
 0x4c1   : > { %1049 = vsyncadd (%p828_p12), %s605_s12, 4294967168  ;;  %p19_p7 = scmp.ge.s32.totalorder %s1176_s15, 4   ;;  %s1347_s18 = smov %s1056_s19 }
 0x4c2   : > { %s1348_s19 = smov %s1060_s20  ;;  %s1349_s20 = smov %s1192_s27 }
 0x4c3   : > { %s1350_s21 = smov %s1176_s15  ;;  %21 = sbr.rel (!%p19_p7) target bundleno = 6 (0x6), region = 93 }
 0x4c8   :  { %610 = vsyncpa [#allocation3], 1 }
 0x4c9   :  { %612 = vsyncpa [#allocation3 + $0x1], 1 }
 0x4ca   :  { %613 = vsyncpa [#allocation6], 1 }
 0x4cb   :  { %614 = vsyncpa [#allocation4], 1 }
 0x4cc   :  { %616 = vsyncpa [#allocation4 + $0x1], 1 }

// kernel: tpu_custom_call.1
= control target key start
LH: loop header
LB: loop body
LE: loop exit
PB: predicated region body
PF: predicated region fallthrough
CT: control target
= control target key end

     0   :  { %10 = vsyncpa [#allocation3], 0  ;;  %s1323_s0 = inlined_call_operand.hbm [shape: f32[16,128], index: 0, kind: input, shape index: {}]   ;;  %s1324_s1 = inlined_call_operand.hbm [shape: f32[128,128], index: 1, kind: input, shape index: {}]   ;;  %s1325_s2 = inlined_call_operand.vmem [shape: f32[1,128], index: 2, kind: input, shape index: {}]   ;;  %s1326_s3 = inlined_call_operand.hbm [shape: f32[128,128], index: 3, kind: input, shape index: {}]   ;;  %s1327_s4 = inlined_call_operand.vmem [shape: f32[1,128], index: 4, kind: input, shape index: {}]   ;;  %s1328_s5 = inlined_call_operand.hbm [shape: f32[16,128], index: 5, kind: output, shape index: {}]  }
   0x1   :  { %12 = vsyncpa [#allocation3 + $0x1], 0 }
   0x2   :  { %13 = vsyncpa [#allocation6], 0 }
   0x3   :  { %14 = vsyncpa [#allocation4], 0 }
   0x4   :  { %16 = vsyncpa [#allocation4 + $0x1], 0  ;;  %s1104_s18 = smov 0   ;;  %s1106_s19 = smov 0  }
   0x5   :  { %s1108_s20 = smov 0   ;;  %s1110_s21 = smov 0  }
   0x6 LB: > { %s1125_s22 = sadd.s32 4294967295, %s1064_s21   ;;  %s681_s23 = sadd.s32 4294967294, %s1064_s21   ;;  %s1064_s21 = sphi %s1110_s21, %s1350_s21   ;;  %s1060_s20 = sphi %s1108_s20, %s1349_s20   ;;  %s1056_s19 = sphi %s1106_s19, %s1348_s19   ;;  %s1052_s18 = sphi %s1104_s18, %s1347_s18  }
   0x7   : > { %p42_p0 = scmp.ne.s32.totalorder %s1056_s19, %s1052_s18  ;;  %p1329_p1 = scmp.eq.s32.totalorder %s1125_s22, 0 }
   0x8   : > { %p156_p3 = scmp.eq.s32.totalorder %s681_s23, 1  ;;  %p682_p5 = scmp.ge.s32.totalorder %s1064_s21, 1 }
   0x9   : > { %p1134_p4 = por %p1329_p1, %p42_p0  ;;  %p163_p7 = scmp.lt.s32.totalorder %s1064_s21, 3 }
   0xa   : > { %p1139_p6 = por %p156_p3, %p42_p0  ;;  %s1066_s27 = smov [#allocation5]  }
   0xb   : > { %s1333_s24 = scalar_select %p1134_p4, 1, 0 }
   0xc   : > { %s1334_s25 = scalar_select %p1139_p6, 1, 0 }
   0xd   : > { %p1144_p8 = pnand %p682_p5, %p163_p7  ;;  %s175_s28 = sshll.u32 %s1066_s27, 4  ;;  %s176_s28 = int_to_ptr.vmem [resolvable:$true] %s175_s28 }
   0xe   : > { %s1067_s30 = smov [#allocation7]   ;;  %s927_s7 = scalar_lea.vmem %s176_s28, 2048 }
   0xf   : > { %s1335_s26 = scalar_select %p1144_p8, 1, 0 }
  0x10   : > { %p815_p9 = pneg %p1144_p8  ;;  %s191_s6 = sshll.u32 %s1067_s30, 4  ;;  %s192_s6 = int_to_ptr.vmem [resolvable:$true] %s191_s6 }
  0x11   : > { %p928_p13 = scmp.ne.s32.totalorder %s176_s28, %s927_s7  ;;  %p935_p5 = scmp.lt.s32.totalorder %s176_s28, %s176_s28 }
  0x12   : > { %p1153_p11 = pnand %p815_p9, %p1329_p1  ;;  %p936_p7 = scmp.lt.s32.totalorder %s927_s7, %s927_s7 }
  0x14   : > { %p918_p12 = pneg %p1153_p11  ;;  %p937_p10 = por %p936_p7, %p935_p5 }
  0x16   : > { %p930_p0 = pnand %p928_p13, %p918_p12 }
  0x18   : > { %p931_p3 = pneg %p930_p0 }
  0x1a   : > { %p938_p9 = pnand %p937_p10, %p931_p3 }
  0x1c   : > { %941 = shalt.err (!%p938_p9)
}
  0x1d   : > { %s1068_s8 = smov 128   ;;  %s1069_s9 = smov 8  }
  0x1e   : > { %818 = dma.hbm_to_vmem [thread:$0]  (!%p1153_p11), %s1324_s1, 2048, %s176_s28, [#allocation6], %s1068_s8, %s1068_s8, %s1069_s9  }
  0x1f   : > { %s953_s12 = scalar_lea.vmem %s192_s6, 2048  ;;  %p961_p2 = scmp.lt.s32.totalorder %s192_s6, %s192_s6 }
  0x20   : > { %p954_p1 = scmp.ne.s32.totalorder %s192_s6, %s953_s12  ;;  %p962_p6 = scmp.lt.s32.totalorder %s953_s12, %s953_s12 }
  0x22   : > { %p956_p13 = pnand %p954_p1, %p918_p12  ;;  %p963_p5 = por %p962_p6, %p961_p2 }
  0x24   : > { %p957_p0 = pneg %p956_p13 }
  0x26   : > { %p964_p10 = pnand %p963_p5, %p957_p0 }
  0x28   : > { %967 = shalt.err (!%p964_p10)
}
  0x29   : > { %821 = dma.hbm_to_vmem [thread:$0]  (!%p1153_p11), %s1326_s3, 2048, %s192_s6, [#allocation6], %s1068_s8, %s1068_s8, %s1069_s9  }
  0x2a   : > { %s1176_s15 = sadd.s32 1, %s1064_s21   ;;  %s29_s16 = sadd.s32 1, %s1060_s20 }
  0x2b   : > { %s26_s17 = ssub.s32 %s1064_s21, %s1176_s15  ;;  %p36_p1 = scmp.ne.s32.totalorder %s1060_s20, %s1056_s19 }
  0x2c   : > { %p27_p2 = scmp.eq.s32.totalorder %s26_s17, 0  ;;  %p37_p6 = scmp.eq.s32.totalorder %s1064_s21, 0 }
  0x2d   : > { %p1337_p12 = scmp.eq.s32.totalorder %s1125_s22, 1  ;;  %p832_p7 = scmp.lt.s32.totalorder %s1064_s21, 2 }
  0x2e   : > { %s1192_s27 = scalar_select %p27_p2, %s1060_s20, %s29_s16  }
  0x2f   : > { %p1186_p3 = por %p1337_p12, %p36_p1  ;;  %p38_p9 = por %p37_p6, %p36_p1 }
  0x30   : > { %s208_s28 = sand.u32 1, %s1060_s20   ;;  %s687_s30 = sshll.u32 %s1064_s21, 7 }
  0x31   : > { %s1338_s23 = scalar_select %p1186_p3, 1, 0 }
  0x32   : > { %s686_s29 = sshll.u32 %s208_s28, 3  ;;  %s1199_s8 = scalar_lea.hbm %s1323_s0, %s687_s30 }
  0x33   : > { %s212_s9 = scalar_lea.vmem [#allocation2], %s686_s29  ;;  %p1201_p11 = pnand %p832_p7, %p38_p9 }
  0x34   : > { %s219_s10 = sshll.u32 %s212_s9, 4  ;;  %s209_s12 = scalar_lea.sflag [#allocation3], %s208_s28  ;;  %s220_s10 = int_to_ptr.vmem [resolvable:$true] %s219_s10 }
  0x35   : > { %s968_s13 = scalar_lea.hbm %s1199_s8, 128  ;;  %p970_p0 = pneg %p1201_p11 }
  0x36   : > { %p969_p13 = scmp.ne.s32.totalorder %s1199_s8, %s968_s13  ;;  %s973_s17 = scalar_lea.hbm %s1323_s0, 256 }
  0x37   : > { %p974_p1 = scmp.lt.s32.totalorder %s1199_s8, %s1323_s0  ;;  %p975_p2 = scmp.lt.s32.totalorder %s973_s17, %s968_s13 }
  0x38   : > { %p971_p5 = pnand %p970_p0, %p969_p13 }
  0x39   : > { %p976_p6 = por %p975_p2, %p974_p1 }
  0x3a   : > { %p972_p10 = pneg %p971_p5 }
  0x3c   : > { %p977_p12 = pnand %p976_p6, %p972_p10 }
  0x3e   : > { %980 = shalt.err (!%p977_p12)
}
  0x3f   : > { %s981_s6 = scalar_lea.vmem %s220_s10, 128  ;;  %s1070_s28 = smov [#allocation2]  }
  0x40   : > { %p982_p7 = scmp.ne.s32.totalorder %s220_s10, %s981_s6  ;;  %s986_s7 = sshll.u32 %s1070_s28, 4  ;;  %s987_s7 = int_to_ptr.vmem [resolvable:$false] %s986_s7 }
  0x41   : > { %s988_s9 = scalar_lea.vmem %s987_s7, 256  ;;  %p989_p13 = scmp.lt.s32.totalorder %s220_s10, %s987_s7 }
  0x42   : > { %p984_p9 = pnand %p982_p7, %p970_p0  ;;  %p990_p5 = scmp.lt.s32.totalorder %s988_s9, %s981_s6 }
  0x44   : > { %p985_p3 = pneg %p984_p9  ;;  %p991_p4 = por %p990_p5, %p989_p13 }
  0x46   : > { %p992_p8 = pnand %p991_p4, %p985_p3 }
  0x48   : > { %995 = shalt.err (!%p992_p8)
}
  0x49   : > { %825 = dma.hbm_to_vmem [thread:$0]  (!%p1201_p11), %s1199_s8, 128, %s220_s10, %s209_s12  }
  0x4a   : > { %p1340_p10 = scmp.ne.s32.totalorder %s1335_s26, 0 }
  0x4b   : > { %s1222_s13 = sand.u32 (!%p1340_p10), 1, %s1056_s19   ;;  %p1341_p4 = scmp.ne.s32.totalorder (!%p1340_p10), %s1333_s24, 0 }
  0x4c   : > { %228 = sbr.rel (%p1340_p10) target bundleno = 1209 (0x4b9), region = 40  ;;  %s689_s14 = sshll.u32 (!%p1340_p10), %s1222_s13, 3 }
  0x4d   : > { %s231_s16 = scalar_lea.sflag (!%p1340_p10), [#allocation3], %s1222_s13  ;;  %s234_s17 = scalar_lea.vmem (!%p1340_p10), [#allocation2], %s689_s14 }
  0x51   : > { %1039 = dma.done.wait (%p1341_p4), %s231_s16, 128  }
  0x52   : > { %1041 = vsyncadd (%p1341_p4), %s231_s16, 4294967168  ;;  %p1342_p8 = scmp.eq.s32.totalorder %s1125_s22, 0 }
  0x54   : > { %1043 = dma.done.wait (%p1342_p8), [#allocation6], 4096   ;;  %p1343_p3 = pmov %p1342_p8 }
  0x55   : > { %v1236_v0 = vld [vmem:[%s234_s17] sm:$0xff]  ;;  %v1071_v3 = vmov 0.0   ;;  %vm1072_vm0 = vmmov 0   ;;  %v309_v5 = vld [vmem:[#allocation5 + $0x68] sm:$0xff]  ;;  %v308_v6 = vld [vmem:[#allocation5 + $0x60] sm:$0xff]  ;;  %s696_s11 = sshll.u32 %s1125_s22, 7 }
  0x56   : > { %1045 = vsyncadd (%p1343_p3), [#allocation6], 4294963200  ;;  %v272_v1 = vmul.f32 %v1236_v0, %v1236_v0  ;;  %v311_v2 = vld [vmem:[#allocation5 + $0x78] sm:$0xff]  ;;  %733 = vmatprep.subr.mxu0 %v1071_v3  ;;  %v310_v4 = vld [vmem:[#allocation5 + $0x70] sm:$0xff]  ;;  %765 = vmatprep.mubr.msk.f32.mxu0 %vm1072_vm0, %v1071_v3  ;;  %s268_s12 = scalar_lea.vmem [#allocation8], %s689_s14  ;;  %s590_s28 = scalar_lea.hbm %s1328_s5, %s696_s11 }
  0x57   : > { %734 = vmatpush3.msra.mxu0 %v311_v2  ;;  %768 = vmatprep.subr.mxu1 %v1071_v3  ;;  %v307_v7 = vld [vmem:[#allocation5 + $0x58] sm:$0xff]  ;;  %v306_v8 = vld [vmem:[#allocation5 + $0x50] sm:$0xff]  ;;  %v305_v9 = vld [vmem:[#allocation5 + $0x48] sm:$0xff]  ;;  %s592_s30 = sshll.u32 %s268_s12, 4  ;;  %s579_s7 = scalar_lea.sflag [#allocation4], %s1222_s13  ;;  %s593_s30 = int_to_ptr.vmem [resolvable:$true] %s592_s30 }
  0x58   : > { %273 = vadd.xlane.f32.xlu0 %v272_v1  ;;  %735 = vmatprep.subr.mxu0 %v1071_v3  ;;  %v304_v10 = vld [vmem:[#allocation5 + $0x40] sm:$0xff]  ;;  %v303_v11 = vld [vmem:[#allocation5 + $0x38] sm:$0xff]  ;;  %v302_v12 = vld [vmem:[#allocation5 + $0x30] sm:$0xff]  ;;  %s996_s9 = scalar_lea.vmem %s593_s30, 128  ;;  %p1344_p0 = scmp.ne.s32.totalorder %s1338_s23, 0 }
  0x59   : > { %800 = vmatprep.mubr.msk.f32.mxu1 %vm1072_vm0, %v1071_v3  ;;  %736 = vmatpush3.msra.mxu0 %v310_v4  ;;  %v301_v13 = vld [vmem:[#allocation5 + $0x28] sm:$0xff]  ;;  %v300_v14 = vld [vmem:[#allocation5 + $0x20] sm:$0xff]  ;;  %v299_v15 = vld [vmem:[#allocation5 + $0x18] sm:$0xff]  ;;  %p997_p11 = scmp.ne.s32.totalorder %s593_s30, %s996_s9  ;;  %s1073_s16 = smov [#allocation8]  }
  0x5a   : > { %737 = vmatprep.subr.mxu0 %v1071_v3  ;;  %v298_v16 = vld [vmem:[#allocation5 + $0x10] sm:$0xff]  ;;  %v297_v17 = vld [vmem:[#allocation5 + $0x8] sm:$0xff]  ;;  %v296_v18 = vld [vmem:[#allocation5] sm:$0xff]  ;;  %s1000_s17 = sshll.u32 %s1073_s16, 4  ;;  %s1001_s17 = int_to_ptr.vmem [resolvable:$false] %s1000_s17 }
  0x5b   : > { %738 = vmatpush3.msra.mxu0 %v309_v5  ;;  %v693_v39 = vld [vmem:[%s1325_s2] ss:$0 sm:$0xff]  ;;  %v476_v46 = vld [vmem:[#allocation7 + $0x78] sm:$0xff]  ;;  %v474_v48 = vld [vmem:[#allocation7 + $0x68] sm:$0xff]  ;;  %p998_p1 = pnand %p997_p11, %p1344_p0  ;;  %s1002_s22 = scalar_lea.vmem %s1001_s17, 256 }
  0x5c   : > { %739 = vmatprep.subr.mxu0 %v1071_v3  ;;  %v475_v47 = vld [vmem:[#allocation7 + $0x70] sm:$0xff]  ;;  %769 = vmatpush3.msra.mxu1 %v476_v46  ;;  %v473_v49 = vld [vmem:[#allocation7 + $0x60] sm:$0xff]  ;;  %v472_v50 = vld [vmem:[#allocation7 + $0x58] sm:$0xff]  ;;  %p1003_p6 = scmp.lt.s32.totalorder %s593_s30, %s1001_s17  ;;  %p1004_p12 = scmp.lt.s32.totalorder %s1002_s22, %s996_s9 }
  0x5d   : > { %740 = vmatpush3.msra.mxu0 %v308_v6  ;;  %770 = vmatprep.subr.mxu1 %v1071_v3  ;;  %v471_v51 = vld [vmem:[#allocation7 + $0x50] sm:$0xff]  ;;  %v470_v52 = vld [vmem:[#allocation7 + $0x48] sm:$0xff]  ;;  %v469_v53 = vld [vmem:[#allocation7 + $0x40] sm:$0xff]  ;;  %p999_p2 = pneg %p998_p1 }
  0x5e   : > { %741 = vmatprep.subr.mxu0 %v1071_v3  ;;  %771 = vmatpush3.msra.mxu1 %v475_v47  ;;  %v468_v54 = vld [vmem:[#allocation7 + $0x38] sm:$0xff]  ;;  %v467_v55 = vld [vmem:[#allocation7 + $0x30] sm:$0xff]  ;;  %v466_v56 = vld [vmem:[#allocation7 + $0x28] sm:$0xff]  ;;  %p1005_p7 = por %p1004_p12, %p1003_p6 }
  0x5f   : > { %742 = vmatpush3.msra.mxu0 %v307_v7  ;;  %772 = vmatprep.subr.mxu1 %v1071_v3  ;;  %v465_v57 = vld [vmem:[#allocation7 + $0x20] sm:$0xff]  ;;  %v464_v58 = vld [vmem:[#allocation7 + $0x18] sm:$0xff]  ;;  %v463_v59 = vld [vmem:[#allocation7 + $0x10] sm:$0xff] }
  0x60   : > { %743 = vmatprep.subr.mxu0 %v1071_v3  ;;  %773 = vmatpush3.msra.mxu1 %v474_v48  ;;  %v462_v60 = vld [vmem:[#allocation7 + $0x8] sm:$0xff]  ;;  %v461_v61 = vld [vmem:[#allocation7] sm:$0xff]  ;;  %p1006_p9 = pnand %p1005_p7, %p999_p2 }
  0x61   : > { %744 = vmatpush3.msra.mxu0 %v306_v8  ;;  %774 = vmatprep.subr.mxu1 %v1071_v3 }
  0x62   : > { %745 = vmatprep.subr.mxu0 %v1071_v3  ;;  %775 = vmatpush3.msra.mxu1 %v473_v49 }
  0x63   : > { %746 = vmatpush3.msra.mxu0 %v305_v9  ;;  %776 = vmatprep.subr.mxu1 %v1071_v3 }
  0x64   : > { %747 = vmatprep.subr.mxu0 %v1071_v3  ;;  %777 = vmatpush3.msra.mxu1 %v472_v50 }
  0x65   : > { %748 = vmatpush3.msra.mxu0 %v304_v10  ;;  %778 = vmatprep.subr.mxu1 %v1071_v3 }
  0x66   : > { %749 = vmatprep.subr.mxu0 %v1071_v3  ;;  %779 = vmatpush3.msra.mxu1 %v471_v51 }
  0x67   : > { %750 = vmatpush3.msra.mxu0 %v303_v11  ;;  %780 = vmatprep.subr.mxu1 %v1071_v3 }
  0x68   : > { %751 = vmatprep.subr.mxu0 %v1071_v3  ;;  %781 = vmatpush3.msra.mxu1 %v470_v52 }
  0x69   : > { %752 = vmatpush3.msra.mxu0 %v302_v12  ;;  %782 = vmatprep.subr.mxu1 %v1071_v3 }
  0x6a   : > { %753 = vmatprep.subr.mxu0 %v1071_v3  ;;  %783 = vmatpush3.msra.mxu1 %v469_v53 }
  0x6b   : > { %754 = vmatpush3.msra.mxu0 %v301_v13  ;;  %784 = vmatprep.subr.mxu1 %v1071_v3 }
  0x6c   : > { %755 = vmatprep.subr.mxu0 %v1071_v3  ;;  %785 = vmatpush3.msra.mxu1 %v468_v54 }
  0x6d   : > { %756 = vmatpush3.msra.mxu0 %v300_v14  ;;  %786 = vmatprep.subr.mxu1 %v1071_v3 }
  0x6e   : > { %757 = vmatprep.subr.mxu0 %v1071_v3  ;;  %787 = vmatpush3.msra.mxu1 %v467_v55 }
  0x6f   : > { %758 = vmatpush3.msra.mxu0 %v299_v15  ;;  %788 = vmatprep.subr.mxu1 %v1071_v3 }
  0x70   : > { %759 = vmatprep.subr.mxu0 %v1071_v3  ;;  %789 = vmatpush3.msra.mxu1 %v466_v56 }
  0x71   : > { %760 = vmatpush3.msra.mxu0 %v298_v16  ;;  %790 = vmatprep.subr.mxu1 %v1071_v3 }
  0x72   : > { %761 = vmatprep.subr.mxu0 %v1071_v3  ;;  %791 = vmatpush3.msra.mxu1 %v465_v57 }
  0x73   : > { %762 = vmatpush3.msra.mxu0 %v297_v17  ;;  %792 = vmatprep.subr.mxu1 %v1071_v3 }
  0x74   : > { %763 = vmatprep.subr.mxu0 %v1071_v3  ;;  %793 = vmatpush3.msra.mxu1 %v464_v58 }
  0x75   : > { %764 = vmatpush3.msra.mxu0 %v296_v18  ;;  %794 = vmatprep.subr.mxu1 %v1071_v3 }
  0x76   : > { %795 = vmatpush3.msra.mxu1 %v463_v59 }
  0x77   : > { %796 = vmatprep.subr.mxu1 %v1071_v3 }
  0x78   : > { %797 = vmatpush3.msra.mxu1 %v462_v60 }
  0x79   : > { %798 = vmatprep.subr.mxu1 %v1071_v3 }
  0x7a   : > { %799 = vmatpush3.msra.mxu1 %v461_v61 }
  0xe1   : > { %v274_v19 = vpop.xlane.xlu0 %273 }
  0xe2   : > { %874 = vrsqrt.f32 %v274_v19  ;;  %vm277_vm1 = vcmp.eq.f32.partialorder %v274_v19, inf  ;;  %v280_v22 = vand.u32 2147483648, %v274_v19  ;;  %vm279_vm2 = vcmp.eq.f32.partialorder %v274_v19, 0.0 }
  0xef   : > { %v875_v20 = vpop.eup %874 }
  0xf0   : > { %v276_v21 = vmul.f32 %v875_v20, %v274_v19 }
  0xf2   : > { %v278_v23 = vsel %vm277_vm1, %v274_v19, %v276_v21 }
  0xf3   : > { %v281_v24 = vsel %vm279_vm2, %v280_v22, %v278_v23 }
  0xf4   : > { %v282_v25 = vmul.f32 0.2236068, %v281_v24  ;;  %v291_v28 = vmax.f32 %v281_v24, 1e-06 }
  0xf6   : > { %v283_v26 = vmin.f32 %v282_v25, 0.999999  ;;  %v292_v32 = vmul.f32 0.2236068, %v291_v28 }
  0xf8   : > { %v285_v27 = vsub.f32 1.0, %v283_v26  ;;  %v284_v29 = vadd.f32 1.0, %v283_v26 }
  0xfa   : > { %876 = vrcp.f32 %v285_v27 }
 0x107   : > { %v877_v30 = vpop.eup %876 }
 0x108   : > { %v287_v31 = vmul.f32 %v877_v30, %v284_v29 }
 0x10a   : > { %878 = vlog2.f32 %v287_v31 }
 0x10b   : > { %880 = vrcp.f32 %v292_v32 }
 0x117   : > { %v879_v33 = vpop.eup %878 }
 0x118   : > { %v289_v34 = vmul.f32 0.6931472, %v879_v33  ;;  %v881_v36 = vpop.eup %880 }
 0x11a   : > { %v290_v35 = vmul.f32 0.5, %v289_v34 }
 0x11c   : > { %v294_v37 = vmul.f32 %v881_v36, %v290_v35 }
 0x11e   : > { %v295_v38 = vmul.f32 %v294_v37, %v1236_v0 }
 0x120   : > { %766 = vmatmul.mubr.f32.vlgmr.msra.gmra.mxu0 %v295_v38 }
 0x1e0   : > { %v384_v40 = vpop.f32.mrf.mxu0 }
 0x1e1   : > { %v385_v41 = vadd.f32 %v693_v39, %v384_v40 }
 0x1e2   : > { %v767_v42 = vpop.f32.mrf.mxu0 }
 0x1e3   : > { %v388_v43 = vmul.f32 %v385_v41, %v385_v41  ;;  %v1263_v44 = vmax.f32 %v385_v41, 0.0 }
 0x1e5   : > { %389 = vadd.xlane.f32.xlu0 %v388_v43  ;;  %v427_v45 = vmul.f32 %v1263_v44, %v1263_v44 }
 0x1e7   : > { %428 = vadd.xlane.f32.xlu1 %v427_v45 }
 0x26e   : > { %v390_v62 = vpop.xlane.xlu0 %389 }
 0x26f   : > { %882 = vrsqrt.f32 %v390_v62  ;;  %vm393_vm3 = vcmp.eq.f32.partialorder %v390_v62, inf  ;;  %v396_v1 = vand.u32 2147483648, %v390_v62  ;;  %vm395_vm4 = vcmp.eq.f32.partialorder %v390_v62, 0.0 }
 0x270   : > { %v429_v19 = vpop.xlane.xlu1 %428 }
 0x271   : > { %vm432_vm6 = vcmp.eq.f32.partialorder %v429_v19, inf  ;;  %v435_v34 = vand.u32 2147483648, %v429_v19  ;;  %vm434_vm7 = vcmp.eq.f32.partialorder %v429_v19, 0.0 }
 0x27c   : > { %v883_v63 = vpop.eup %882 }
 0x27d   : > { %v392_v0 = vmul.f32 %v883_v63, %v390_v62 }
 0x27f   : > { %v394_v2 = vsel %vm393_vm3, %v390_v62, %v392_v0  ;;  %v694_v62 = vld [vmem:[%s1327_s4] ss:$0 sm:$0xff] }
 0x280   : > { %v397_v4 = vsel %vm395_vm4, %v396_v1, %v394_v2 }
 0x281   : > { %v398_v5 = vmul.f32 0.2236068, %v397_v4  ;;  %v400_v6 = vmax.f32 %v397_v4, 1e-06 }
 0x283   : > { %v401_v7 = vmul.f32 0.2236068, %v400_v6  ;;  %884 = vtanh.f32 %v398_v5 }
 0x285   : > { %886 = vrcp.f32 %v401_v7 }
 0x290   : > { %v885_v8 = vpop.eup %884 }
 0x292   : > { %v887_v9 = vpop.eup %886 }
 0x293   : > { %v403_v10 = vmul.f32 %v887_v9, %v885_v8 }
 0x295   : > { %v404_v11 = vmul.f32 %v403_v10, %v397_v4 }
 0x297   : > { %v406_v3 = vmax.f32 %v404_v11, 1e-06  ;;  %vm405_vm5 = vcmp.gt.f32.partialorder %v404_v11, 0.999 }
 0x299   : > { %888 = vrcp.f32 %v406_v3 }
 0x2a6   : > { %v889_v12 = vpop.eup %888 }
 0x2a7   : > { %v408_v13 = vmul.f32 0.999, %v889_v12 }
 0x2a9   : > { %v409_v14 = vsel %vm405_vm5, %v408_v13, 1.0 }
 0x2aa   : > { %v410_v15 = vmul.f32 %v409_v14, %v404_v11  ;;  %v411_v32 = vmul.f32 %v409_v14, %v403_v10 }
 0x2ac   : > { %v412_v16 = vmul.f32 0.2236068, %v410_v15  ;;  %v421_v21 = vmax.f32 %v410_v15, 1e-06 }
 0x2ae   : > { %v413_v17 = vmin.f32 %v412_v16, 0.999999  ;;  %v422_v24 = vmul.f32 0.2236068, %v421_v21 }
 0x2b0   : > { %v415_v18 = vsub.f32 1.0, %v413_v17  ;;  %v414_v20 = vadd.f32 1.0, %v413_v17 }
 0x2b2   : > { %890 = vrcp.f32 %v415_v18 }
 0x2b3   : > { %892 = vrsqrt.f32 %v429_v19 }
 0x2bf   : > { %v891_v22 = vpop.eup %890 }
 0x2c0   : > { %v417_v23 = vmul.f32 %v891_v22, %v414_v20  ;;  %v893_v25 = vpop.eup %892 }
 0x2c1   : > { %v431_v27 = vmul.f32 %v893_v25, %v429_v19 }
 0x2c2   : > { %894 = vlog2.f32 %v417_v23 }
 0x2c3   : > { %896 = vrcp.f32 %v422_v24  ;;  %v433_v31 = vsel %vm432_vm6, %v429_v19, %v431_v27 }
 0x2c4   : > { %v436_v36 = vsel %vm434_vm7, %v435_v34, %v433_v31 }
 0x2cf   : > { %v895_v26 = vpop.eup %894 }
 0x2d0   : > { %v419_v28 = vmul.f32 0.6931472, %v895_v26  ;;  %v897_v30 = vpop.eup %896 }
 0x2d2   : > { %v420_v29 = vmul.f32 0.5, %v419_v28 }
 0x2d4   : > { %v424_v33 = vmul.f32 %v897_v30, %v420_v29 }
 0x2d6   : > { %v425_v35 = vmul.f32 %v424_v33, %v411_v32 }
 0x2d8   : > { %v437_v37 = vmul.f32 %v436_v36, %v425_v35 }
 0x2da   : > { %v438_v38 = vmul.f32 0.2236068, %v437_v37  ;;  %v440_v39 = vmax.f32 %v437_v37, 1e-06 }
 0x2dc   : > { %v441_v40 = vmul.f32 0.2236068, %v440_v39  ;;  %898 = vtanh.f32 %v438_v38 }
 0x2de   : > { %900 = vrcp.f32 %v441_v40 }
 0x2e9   : > { %v899_v41 = vpop.eup %898 }
 0x2eb   : > { %v901_v42 = vpop.eup %900 }
 0x2ec   : > { %v443_v43 = vmul.f32 %v901_v42, %v899_v41 }
 0x2ee   : > { %v444_v45 = vmul.f32 %v443_v43, %v437_v37  ;;  %v445_v46 = vmul.f32 %v443_v43, %v425_v35 }
 0x2f0   : > { %v446_v47 = vmul.f32 0.2236068, %v444_v45  ;;  %v455_v51 = vmax.f32 %v444_v45, 1e-06 }
 0x2f2   : > { %v447_v48 = vmin.f32 %v446_v47, 0.999999  ;;  %v456_v54 = vmul.f32 0.2236068, %v455_v51 }
 0x2f4   : > { %v449_v49 = vsub.f32 1.0, %v447_v48  ;;  %v448_v50 = vadd.f32 1.0, %v447_v48 }
 0x2f6   : > { %902 = vrcp.f32 %v449_v49 }
 0x303   : > { %v903_v52 = vpop.eup %902 }
 0x304   : > { %v451_v53 = vmul.f32 %v903_v52, %v448_v50 }
 0x306   : > { %904 = vlog2.f32 %v451_v53 }
 0x307   : > { %906 = vrcp.f32 %v456_v54 }
 0x313   : > { %v905_v55 = vpop.eup %904 }
 0x314   : > { %v453_v56 = vmul.f32 0.6931472, %v905_v55  ;;  %v907_v58 = vpop.eup %906 }
 0x316   : > { %v454_v57 = vmul.f32 0.5, %v453_v56 }
 0x318   : > { %v458_v59 = vmul.f32 %v907_v58, %v454_v57 }
 0x31a   : > { %v459_v60 = vmul.f32 %v458_v59, %v445_v46 }
 0x31c   : > { %v460_v61 = vmul.f32 %v459_v60, %v1263_v44 }
 0x31e   : > { %801 = vmatmul.mubr.f32.vlgmr.msra.gmra.mxu1 %v460_v61 }
 0x3de   : > { %v549_v63 = vpop.f32.mrf.mxu1 }
 0x3df   : > { %v550_v0 = vadd.f32 %v694_v62, %v549_v63 }
 0x3e0   : > { %v802_v1 = vpop.f32.mrf.mxu1 }
 0x3e1   : > { %v553_v2 = vmul.f32 %v550_v0, %v550_v0 }
 0x3e3   : > { %554 = vadd.xlane.f32.xlu1 %v553_v2 }
 0x46c   : > { %v555_v4 = vpop.xlane.xlu1 %554 }
 0x46d   : > { %908 = vrsqrt.f32 %v555_v4  ;;  %vm558_vm8 = vcmp.eq.f32.partialorder %v555_v4, inf  ;;  %v561_v7 = vand.u32 2147483648, %v555_v4  ;;  %vm560_vm9 = vcmp.eq.f32.partialorder %v555_v4, 0.0 }
 0x47a   : > { %v909_v5 = vpop.eup %908 }
 0x47b   : > { %v557_v6 = vmul.f32 %v909_v5, %v555_v4 }
 0x47d   : > { %v559_v8 = vsel %vm558_vm8, %v555_v4, %v557_v6 }
 0x47e   : > { %v562_v9 = vsel %vm560_vm9, %v561_v7, %v559_v8 }
 0x47f   : > { %v563_v44 = vmul.f32 0.2236068, %v562_v9  ;;  %v565_v10 = vmax.f32 %v562_v9, 1e-06 }
 0x481   : > { %v566_v11 = vmul.f32 0.2236068, %v565_v10  ;;  %910 = vtanh.f32 %v563_v44 }
 0x483   : > { %912 = vrcp.f32 %v566_v11 }
 0x48e   : > { %v911_v3 = vpop.eup %910 }
 0x490   : > { %v913_v12 = vpop.eup %912 }
 0x491   : > { %v568_v13 = vmul.f32 %v913_v12, %v911_v3 }
 0x493   : > { %v569_v14 = vmul.f32 %v568_v13, %v562_v9 }
 0x495   : > { %v571_v15 = vmax.f32 %v569_v14, 1e-06  ;;  %vm570_vm10 = vcmp.gt.f32.partialorder %v569_v14, 0.999 }
 0x497   : > { %914 = vrcp.f32 %v571_v15 }
 0x4a4   : > { %v915_v16 = vpop.eup %914 }
 0x4a5   : > { %v573_v17 = vmul.f32 0.999, %v915_v16 }
 0x4a7   : > { %v574_v18 = vsel %vm570_vm10, %v573_v17, 1.0 }
 0x4a8   : > { %v575_v19 = vmul.f32 %v574_v18, %v568_v13 }
 0x4aa   : > { %v576_v20 = vmul.f32 %v575_v19, %v550_v0 }
 0x4ac   : > { %577 = vst [vmem:[%s268_s12] sm:$0xff] %v576_v20 }
 0x4ad   : > { %1009 = shalt.err (!%p1006_p9)
}
 0x4ae   : > { %s1010_s14 = scalar_lea.hbm %s590_s28, 128  ;;  %s1014_s26 = scalar_lea.hbm %s1328_s5, 256 }
 0x4af   : > { %p1011_p13 = scmp.ne.s32.totalorder %s590_s28, %s1010_s14  ;;  %p1015_p4 = scmp.lt.s32.totalorder %s590_s28, %s1328_s5 }
 0x4b0   : > { %p1016_p8 = scmp.lt.s32.totalorder %s1014_s26, %s1010_s14 }
 0x4b1   : > { %p1012_p5 = pnand %p1011_p13, %p1344_p0 }
 0x4b2   : > { %p1017_p3 = por %p1016_p8, %p1015_p4 }
 0x4b3   : > { %p1013_p10 = pneg %p1012_p5 }
 0x4b5   : > { %p1018_p11 = pnand %p1017_p3, %p1013_p10 }
 0x4b7   : > { %1021 = shalt.err (!%p1018_p11)
}
 0x4b8   : > { %813 = dma.vmem_to_hbm [thread:$0]  (%p1344_p0), %s593_s30, 128, %s590_s28, %s579_s7  }
 0x4b9 PF: > { %s604_s11 = sand.u32 1, %s1052_s18   ;;  %p1345_p1 = scmp.ne.s32.totalorder %s1334_s25, 0 }
 0x4ba   : > { %p1346_p2 = scmp.ge.s32.totalorder %s1064_s21, 2  ;;  %s605_s12 = scalar_lea.sflag [#allocation4], %s604_s11 }
 0x4bc   : > { %p827_p6 = pnand %p1346_p2, %p1345_p1 }
 0x4be   : > { %p828_p12 = pneg %p827_p6 }
 0x4c0   : > { %1047 = dma.done.wait (%p828_p12), %s605_s12, 128  }
 0x4c1   : > { %1049 = vsyncadd (%p828_p12), %s605_s12, 4294967168  ;;  %p19_p7 = scmp.ge.s32.totalorder %s1176_s15, 4   ;;  %s1347_s18 = smov %s1056_s19 }
 0x4c2   : > { %s1348_s19 = smov %s1060_s20  ;;  %s1349_s20 = smov %s1192_s27 }
 0x4c3   : > { %s1350_s21 = smov %s1176_s15  ;;  %21 = sbr.rel (!%p19_p7) target bundleno = 6 (0x6), region = 93 }
 0x4c8   :  { %610 = vsyncpa [#allocation3], 1 }
 0x4c9   :  { %612 = vsyncpa [#allocation3 + $0x1], 1 }
 0x4ca   :  { %613 = vsyncpa [#allocation6], 1 }
 0x4cb   :  { %614 = vsyncpa [#allocation4], 1 }
 0x4cc   :  { %616 = vsyncpa [#allocation4 + $0x1], 1 }

</bundles_post_ra>
